<compile_context>
chip_gen: v7x
topology: tpu7x:2x2x1
jax: 0.10.0
libtpu: 0.0.40
codegen_flags: <defaults>
</compile_context>

<pallas_src>
import jax
import jax.numpy as jnp
from jax.experimental import pallas as pl
from jax.experimental.pallas import tpu as pltpu


def _round_up(a, b):
    return (a + b - 1) // b * b


# --------------------------------------------------------------------------- #
# Kernels
# --------------------------------------------------------------------------- #
def _maxpool_kernel(a_ref, b_ref, c_ref, d_ref, o_ref):
    # Elementwise max over the four 2x2-window candidates.
    o_ref[...] = jnp.maximum(jnp.maximum(a_ref[...], b_ref[...]),
                             jnp.maximum(c_ref[...], d_ref[...]))


def _gemm_affine_relu_kernel(x_ref, w_ref, s_ref, b_ref, o_ref, acc_ref):
    # Tiled GEMM with f32 accumulator; fused (BN scale, BN+conv bias, ReLU)
    # epilogue applied on the last K step.
    @pl.when(pl.program_id(1) == 0)
    def _init():
        acc_ref[...] = jnp.zeros_like(acc_ref)

    acc_ref[...] += jnp.dot(x_ref[...], w_ref[...],
                            preferred_element_type=jnp.float32)

    @pl.when(pl.program_id(1) == pl.num_programs(1) - 1)
    def _finalize():
        y = acc_ref[...] * s_ref[...] + b_ref[...]
        o_ref[...] = jnp.maximum(y, 0.0).astype(o_ref.dtype)


# --------------------------------------------------------------------------- #
# Pallas wrappers
# --------------------------------------------------------------------------- #
def _maxpool2x2(x_nhwc, *, tile_m=512):
    """MaxPool2d(kernel=2, stride=2) on an NHWC tensor."""
    B, H, W, C = x_nhwc.shape
    H2, W2 = H // 2, W // 2
    he, we = 2 * H2, 2 * W2
    # Layout prep (wrapper): the 4 candidates of each 2x2 window as [M, C] slabs.
    a = x_nhwc[:, 0:he:2, 0:we:2, :]
    b = x_nhwc[:, 0:he:2, 1:we:2, :]
    c = x_nhwc[:, 1:he:2, 0:we:2, :]
    d = x_nhwc[:, 1:he:2, 1:we:2, :]
    M = B * H2 * W2
    a, b, c, d = (t.reshape(M, C) for t in (a, b, c, d))

    TM = tile_m if M >= tile_m else _round_up(M, 8)
    Mp = _round_up(M, TM)
    if Mp != M:
        padw = ((0, Mp - M), (0, 0))
        a, b, c, d = (jnp.pad(t, padw) for t in (a, b, c, d))

    out = pl.pallas_call(
        _maxpool_kernel,
        out_shape=jax.ShapeDtypeStruct((Mp, C), x_nhwc.dtype),
        grid_spec=pltpu.PrefetchScalarGridSpec(
            num_scalar_prefetch=0,
            grid=(Mp // TM,),
            in_specs=[pl.BlockSpec((TM, C), lambda i: (i, 0))] * 4,
            out_specs=pl.BlockSpec((TM, C), lambda i: (i, 0)),
        ),
        compiler_params=pltpu.CompilerParams(
            dimension_semantics=("parallel",),
            vmem_limit_bytes=32 * 1024 * 1024,
        ),
    )(a, b, c, d)
    return out[:M].reshape(B, H2, W2, C)


def _gemm_affine_relu(x, w, scale, bias):
    """out = relu((x @ w) * scale + bias); x:[M,K], w:[K,N], scale/bias:[N]."""
    M, K = x.shape
    N = w.shape[1]

    # Tile sizes: M tiles of 256 rows when large (multiple of 8 otherwise);
    # K tiles 128-aligned (lane-dense LHS blocks), capped at 512.
    TM = 256 if M >= 256 else _round_up(M, 8)
    TK = min(512, _round_up(K, 128))
    Mp = _round_up(M, TM)
    Kp = _round_up(K, TK)
    if Mp != M or Kp != K:
        x = jnp.pad(x, ((0, Mp - M), (0, Kp - K)))
    if Kp != K:
        w = jnp.pad(w, ((0, Kp - K), (0, 0)))

    scale2 = scale.reshape(1, N).astype(jnp.float32)
    bias2 = bias.reshape(1, N).astype(jnp.float32)

    cost = pl.CostEstimate(
        flops=2 * Mp * Kp * N,
        transcendentals=0,
        bytes_accessed=(Mp * Kp + Kp * N + Mp * N) * 4,
    )

    out = pl.pallas_call(
        _gemm_affine_relu_kernel,
        out_shape=jax.ShapeDtypeStruct((Mp, N), x.dtype),
        grid_spec=pltpu.PrefetchScalarGridSpec(
            num_scalar_prefetch=0,
            grid=(Mp // TM, Kp // TK),
            in_specs=[
                pl.BlockSpec((TM, TK), lambda i, k: (i, k)),
                pl.BlockSpec((TK, N), lambda i, k: (k, 0)),
                pl.BlockSpec((1, N), lambda i, k: (0, 0)),
                pl.BlockSpec((1, N), lambda i, k: (0, 0)),
            ],
            out_specs=pl.BlockSpec((TM, N), lambda i, k: (i, 0)),
            scratch_shapes=[pltpu.VMEM((TM, N), jnp.float32)],
        ),
        compiler_params=pltpu.CompilerParams(
            dimension_semantics=("parallel", "arbitrary"),
            vmem_limit_bytes=32 * 1024 * 1024,
        ),
        cost_estimate=cost,
    )(x, w, scale2, bias2)
    return out[:M]


def _conv_gemm_bn_relu(x_nhwc, w_gemm, scale, bias, *, ksize, pad):
    """'same' conv (stride 1) + folded BN + ReLU via im2col + fused GEMM kernel."""
    B, H, W, Cin = x_nhwc.shape
    Cout = w_gemm.shape[1]
    xp = jnp.pad(x_nhwc, ((0, 0), (pad, pad), (pad, pad), (0, 0)))
    # im2col: one shifted window per tap, channels kept last (lane-dense).
    patches = jnp.concatenate(
        [xp[:, dy:dy + H, dx:dx + W, :]
         for dy in range(ksize) for dx in range(ksize)], axis=-1)
    lhs = patches.reshape(B * H * W, ksize * ksize * Cin)
    out = _gemm_affine_relu(lhs, w_gemm, scale, bias)
    return out.reshape(B, H, W, Cout)


# --------------------------------------------------------------------------- #
# Parameter handling + forward
# --------------------------------------------------------------------------- #
def fold_params(p, eps=1e-5):
    """One-time weight rearrangement (OIHW -> GEMM layout) and BN folding."""
    def fold(w, b, g, be, m, v, k):
        cout, cin = w.shape[0], w.shape[1]
        wg = jnp.transpose(w, (2, 3, 1, 0)).reshape(k * k * cin, cout)
        s = g / jnp.sqrt(v + eps)
        beff = (b - m) * s + be
        return wg, s, beff

    w1g, s1, b1 = fold(p["w1"], p["b1"], p["g1"], p["be1"], p["m1"], p["v1"], 3)
    w2g, s2, b2 = fold(p["w2"], p["b2"], p["g2"], p["be2"], p["m2"], p["v2"], 5)
    return {"w1g": w1g, "s1": s1, "b1": b1, "w2g": w2g, "s2": s2, "b2": b2}


def down_forward(x_nchw, fp):
    """Forward pass of `Down` (inference mode). x: [B, Cin, H, W] (NCHW)."""
    x = jnp.transpose(x_nchw, (0, 2, 3, 1))          # NCHW -> NHWC (lane-dense C)
    p = _maxpool2x2(x)                               # MaxPool2d(2)
    h = _conv_gemm_bn_relu(p, fp["w1g"], fp["s1"], fp["b1"], ksize=3, pad=1)
    # Dropout(0.5) == identity in eval mode.
    y = _conv_gemm_bn_relu(h, fp["w2g"], fp["s2"], fp["b2"], ksize=5, pad=2)
    return jnp.transpose(y, (0, 3, 1, 2))            # NHWC -> NCHW


def init_params(key, c_in, c_out):
    c_mid = c_out  # DoubleConv default: mid_channels = out_channels
    ks = jax.random.split(key, 12)

    def u(k, shape, fan_in):
        b = 1.0 / jnp.sqrt(fan_in)
        return jax.random.uniform(k, shape, jnp.float32, -b, b)

    return {
        "w1": u(ks[0], (c_mid, c_in, 3, 3), c_in * 9),
        "b1": u(ks[1], (c_mid,), c_in * 9),
        "g1": jax.random.uniform(ks[2], (c_mid,), jnp.float32, 0.5, 1.5),
        "be1": jax.random.normal(ks[3], (c_mid,), jnp.float32) * 0.1,
        "m1": jax.random.normal(ks[4], (c_mid,), jnp.float32) * 0.1,
        "v1": jax.random.uniform(ks[5], (c_mid,), jnp.float32, 0.5, 1.5),
        "w2": u(ks[6], (c_out, c_mid, 5, 5), c_mid * 25),
        "b2": u(ks[7], (c_out,), c_mid * 25),
        "g2": jax.random.uniform(ks[8], (c_out,), jnp.float32, 0.5, 1.5),
        "be2": jax.random.normal(ks[9], (c_out,), jnp.float32) * 0.1,
        "m2": jax.random.normal(ks[10], (c_out,), jnp.float32) * 0.1,
        "v2": jax.random.uniform(ks[11], (c_out,), jnp.float32, 0.5, 1.5),
    }


def _reference(x, p, eps=1e-5):
    """Plain-JAX reference (same math as the PyTorch module in eval mode)."""
    pool = jax.lax.reduce_window(x, jnp.array(-jnp.inf, x.dtype), jax.lax.max,
                                 (1, 1, 2, 2), (1, 1, 2, 2), "VALID")

    def conv_bn_relu(h, w, b, g, be, m, v, pad):
        y = jax.lax.conv_general_dilated(
            h, w, window_strides=(1, 1), padding=[(pad, pad), (pad, pad)],
            dimension_numbers=("NCHW", "OIHW", "NCHW"))
        y = y + b[None, :, None, None]
        y = (y - m[None, :, None, None]) / jnp.sqrt(v[None, :, None, None] + eps)
        y = y * g[None, :, None, None] + be[None, :, None, None]
        return jnp.maximum(y, 0.0)

    h = conv_bn_relu(pool, p["w1"], p["b1"], p["g1"], p["be1"], p["m1"], p["v1"], 1)
    h = conv_bn_relu(h, p["w2"], p["b2"], p["g2"], p["be2"], p["m2"], p["v2"], 2)
    return h


if __name__ == "__main__":
    B, Cin, Cout, H, W = 2, 4, 8, 16, 16

    key = jax.random.PRNGKey(0)
    kx, kp = jax.random.split(key)
    x = jax.random.normal(kx, (B, Cin, H, W), jnp.float32)
    params = init_params(kp, Cin, Cout)
    folded = fold_params(params)

    out = jax.jit(down_forward)(x, folded)
    out = jax.block_until_ready(out)

    ref = _reference(x, params)
    assert out.shape == (B, Cout, H // 2, W // 2), out.shape
    assert jnp.allclose(out, ref, atol=1e-3, rtol=1e-3), \
        float(jnp.max(jnp.abs(out - ref)))

    print("KERNEL_OK")
</pallas_src>

<mosaic_0001>
module attributes {stable_mosaic.version = 11 : i64} {
  func.func @_maxpool_kernel(%arg0: i32, %arg1: memref<128x4xf32, #tpu.memory_space<vmem>>, %arg2: memref<128x4xf32, #tpu.memory_space<vmem>>, %arg3: memref<128x4xf32, #tpu.memory_space<vmem>>, %arg4: memref<128x4xf32, #tpu.memory_space<vmem>>, %arg5: memref<128x4xf32, #tpu.memory_space<vmem>>) attributes {dimension_semantics = [#tpu.dimension_semantics<parallel>], iteration_bounds = array<i64: 1>, scalar_prefetch = 0 : i64, scratch_operands = 0 : i64, tpu.core_type = #tpu.core_type<tc>, window_params = [{transform_indices = @transform_0, window_bounds = array<i64: 128, 4>}, {transform_indices = @transform_1, window_bounds = array<i64: 128, 4>}, {transform_indices = @transform_2, window_bounds = array<i64: 128, 4>}, {transform_indices = @transform_3, window_bounds = array<i64: 128, 4>}, {transform_indices = @transform_4, window_bounds = array<i64: 128, 4>}]} {
    %c0 = arith.constant 0 : index
    %c0_0 = arith.constant 0 : index
    %0 = vector.load %arg1[%c0, %c0_0] : memref<128x4xf32, #tpu.memory_space<vmem>>, vector<128x4xf32>
    %c0_1 = arith.constant 0 : index
    %c0_2 = arith.constant 0 : index
    %1 = vector.load %arg2[%c0_1, %c0_2] : memref<128x4xf32, #tpu.memory_space<vmem>>, vector<128x4xf32>
    %2 = arith.maximumf %0, %1 : vector<128x4xf32>
    %c0_3 = arith.constant 0 : index
    %c0_4 = arith.constant 0 : index
    %3 = vector.load %arg3[%c0_3, %c0_4] : memref<128x4xf32, #tpu.memory_space<vmem>>, vector<128x4xf32>
    %c0_5 = arith.constant 0 : index
    %c0_6 = arith.constant 0 : index
    %4 = vector.load %arg4[%c0_5, %c0_6] : memref<128x4xf32, #tpu.memory_space<vmem>>, vector<128x4xf32>
    %5 = arith.maximumf %3, %4 : vector<128x4xf32>
    %6 = arith.maximumf %2, %5 : vector<128x4xf32>
    %c0_7 = arith.constant 0 : index
    %c0_8 = arith.constant 0 : index
    %7 = vector.load %arg5[%c0_7, %c0_8] : memref<128x4xf32, #tpu.memory_space<vmem>>, vector<128x4xf32>
    tpu.vector_store %arg5[%c0_7, %c0_8], %6 {strides = array<i32>} : memref<128x4xf32, #tpu.memory_space<vmem>>, vector<128x4xf32>,
    return
  }
  func.func @transform_0(%arg0: i32) -> (i32, i32) {
    %c0_i32 = arith.constant 0 : i32
    %c0_i32_0 = arith.constant 0 : i32
    return %arg0, %c0_i32 : i32, i32
  }
  func.func @transform_1(%arg0: i32) -> (i32, i32) {
    %c0_i32 = arith.constant 0 : i32
    %c0_i32_0 = arith.constant 0 : i32
    return %arg0, %c0_i32 : i32, i32
  }
  func.func @transform_2(%arg0: i32) -> (i32, i32) {
    %c0_i32 = arith.constant 0 : i32
    %c0_i32_0 = arith.constant 0 : i32
    return %arg0, %c0_i32 : i32, i32
  }
  func.func @transform_3(%arg0: i32) -> (i32, i32) {
    %c0_i32 = arith.constant 0 : i32
    %c0_i32_0 = arith.constant 0 : i32
    return %arg0, %c0_i32 : i32, i32
  }
  func.func @transform_4(%arg0: i32) -> (i32, i32) {
    %c0_i32 = arith.constant 0 : i32
    %c0_i32_0 = arith.constant 0 : i32
    return %arg0, %c0_i32 : i32, i32
  }
}

module attributes {stable_mosaic.version = 11 : i64} {
  func.func @_gemm_affine_relu_kernel(%arg0: i32, %arg1: i32, %arg2: memref<128x128xf32, #tpu.memory_space<vmem>>, %arg3: memref<128x8xf32, #tpu.memory_space<vmem>>, %arg4: memref<1x8xf32, #tpu.memory_space<vmem>>, %arg5: memref<1x8xf32, #tpu.memory_space<vmem>>, %arg6: memref<128x8xf32, #tpu.memory_space<vmem>>, %arg7: memref<128x8xf32, #tpu.memory_space<vmem>>) attributes {dimension_semantics = [#tpu.dimension_semantics<parallel>, #tpu.dimension_semantics<arbitrary>], iteration_bounds = array<i64: 1, 1>, scalar_prefetch = 0 : i64, scratch_operands = 1 : i64, tpu.core_type = #tpu.core_type<tc>, window_params = [{transform_indices = @transform_0, window_bounds = array<i64: 128, 128>}, {transform_indices = @transform_1, window_bounds = array<i64: 128, 8>}, {pipeline_mode = #tpu.pipeline_mode<synchronous>, transform_indices = @transform_2, window_bounds = array<i64: 1, 8>}, {pipeline_mode = #tpu.pipeline_mode<synchronous>, transform_indices = @transform_3, window_bounds = array<i64: 1, 8>}, {transform_indices = @transform_4, window_bounds = array<i64: 128, 8>}]} {
    %c0_i32 = arith.constant 0 : i32
    %0 = arith.cmpi eq, %arg1, %c0_i32 : i32
    %1 = arith.extui %0 : i1 to i32
    %c0_i32_0 = arith.constant 0 : i32
    %2 = arith.cmpi ne, %1, %c0_i32_0 : i32
    scf.if %2 {
      %cst_10 = arith.constant 0.000000e+00 : f32
      %12 = vector.broadcast %cst_10 : f32 to vector<128x8xf32>
      %c0_11 = arith.constant 0 : index
      %c0_12 = arith.constant 0 : index
      %13 = vector.load %arg7[%c0_11, %c0_12] : memref<128x8xf32, #tpu.memory_space<vmem>>, vector<128x8xf32>
      tpu.vector_store %arg7[%c0_11, %c0_12], %12 {strides = array<i32>} : memref<128x8xf32, #tpu.memory_space<vmem>>, vector<128x8xf32>,
    } else {
    }
    %c0 = arith.constant 0 : index
    %c0_1 = arith.constant 0 : index
    %3 = vector.load %arg7[%c0, %c0_1] : memref<128x8xf32, #tpu.memory_space<vmem>>, vector<128x8xf32>
    %c0_2 = arith.constant 0 : index
    %c0_3 = arith.constant 0 : index
    %4 = vector.load %arg2[%c0_2, %c0_3] : memref<128x128xf32, #tpu.memory_space<vmem>>, vector<128x128xf32>
    %c0_4 = arith.constant 0 : index
    %c0_5 = arith.constant 0 : index
    %5 = vector.load %arg3[%c0_4, %c0_5] : memref<128x8xf32, #tpu.memory_space<vmem>>, vector<128x8xf32>
    %cst = arith.constant dense<0.000000e+00> : vector<128x8xf32>
    %6 = tpu.matmul %4, %5, %cst {dimension_numbers = #tpu.dot_dimension_numbers<[1], [0], [0], [1], [0, 0, 1, 1], [], []>} : vector<128x128xf32>, vector<128x8xf32>, vector<128x8xf32> -> vector<128x8xf32>
    %7 = arith.addf %3, %6 : vector<128x8xf32>
    %c0_6 = arith.constant 0 : index
    %c0_7 = arith.constant 0 : index
    %8 = vector.load %arg7[%c0_6, %c0_7] : memref<128x8xf32, #tpu.memory_space<vmem>>, vector<128x8xf32>
    tpu.vector_store %arg7[%c0_6, %c0_7], %7 {strides = array<i32>} : memref<128x8xf32, #tpu.memory_space<vmem>>, vector<128x8xf32>,
    %c0_i32_8 = arith.constant 0 : i32
    %9 = arith.cmpi eq, %arg1, %c0_i32_8 : i32
    %10 = arith.extui %9 : i1 to i32
    %c0_i32_9 = arith.constant 0 : i32
    %11 = arith.cmpi ne, %10, %c0_i32_9 : i32
    scf.if %11 {
      %c0_10 = arith.constant 0 : index
      %c0_11 = arith.constant 0 : index
      %12 = vector.load %arg7[%c0_10, %c0_11] : memref<128x8xf32, #tpu.memory_space<vmem>>, vector<128x8xf32>
      %c0_12 = arith.constant 0 : index
      %c0_13 = arith.constant 0 : index
      %13 = vector.load %arg4[%c0_12, %c0_13] : memref<1x8xf32, #tpu.memory_space<vmem>>, vector<1x8xf32>
      %14 = vector.broadcast %13 : vector<1x8xf32> to vector<128x8xf32>
      %15 = arith.mulf %12, %14 : vector<128x8xf32>
      %c0_14 = arith.constant 0 : index
      %c0_15 = arith.constant 0 : index
      %16 = vector.load %arg5[%c0_14, %c0_15] : memref<1x8xf32, #tpu.memory_space<vmem>>, vector<1x8xf32>
      %17 = vector.broadcast %16 : vector<1x8xf32> to vector<128x8xf32>
      %18 = arith.addf %15, %17 : vector<128x8xf32>
      %cst_16 = arith.constant 0.000000e+00 : f32
      %19 = vector.broadcast %cst_16 : f32 to vector<128x8xf32>
      %20 = arith.maximumf %18, %19 : vector<128x8xf32>
      %c0_17 = arith.constant 0 : index
      %c0_18 = arith.constant 0 : index
      %21 = vector.load %arg6[%c0_17, %c0_18] : memref<128x8xf32, #tpu.memory_space<vmem>>, vector<128x8xf32>
      tpu.vector_store %arg6[%c0_17, %c0_18], %20 {strides = array<i32>} : memref<128x8xf32, #tpu.memory_space<vmem>>, vector<128x8xf32>,
    } else {
    }
    return
  }
  func.func @transform_0(%arg0: i32, %arg1: i32) -> (i32, i32) {
    %c0_i32 = arith.constant 0 : i32
    return %arg0, %arg1 : i32, i32
  }
  func.func @transform_1(%arg0: i32, %arg1: i32) -> (i32, i32) {
    %c0_i32 = arith.constant 0 : i32
    %c0_i32_0 = arith.constant 0 : i32
    return %arg1, %c0_i32 : i32, i32
  }
  func.func @transform_2(%arg0: i32, %arg1: i32) -> (i32, i32) {
    %c0_i32 = arith.constant 0 : i32
    %c0_i32_0 = arith.constant 0 : i32
    %c0_i32_1 = arith.constant 0 : i32
    return %c0_i32, %c0_i32_0 : i32, i32
  }
  func.func @transform_3(%arg0: i32, %arg1: i32) -> (i32, i32) {
    %c0_i32 = arith.constant 0 : i32
    %c0_i32_0 = arith.constant 0 : i32
    %c0_i32_1 = arith.constant 0 : i32
    return %c0_i32, %c0_i32_0 : i32, i32
  }
  func.func @transform_4(%arg0: i32, %arg1: i32) -> (i32, i32) {
    %c0_i32 = arith.constant 0 : i32
    %c0_i32_0 = arith.constant 0 : i32
    return %arg0, %c0_i32 : i32, i32
  }
}

module attributes {stable_mosaic.version = 11 : i64} {
  func.func @_gemm_affine_relu_kernel(%arg0: i32, %arg1: i32, %arg2: memref<128x256xf32, #tpu.memory_space<vmem>>, %arg3: memref<256x8xf32, #tpu.memory_space<vmem>>, %arg4: memref<1x8xf32, #tpu.memory_space<vmem>>, %arg5: memref<1x8xf32, #tpu.memory_space<vmem>>, %arg6: memref<128x8xf32, #tpu.memory_space<vmem>>, %arg7: memref<128x8xf32, #tpu.memory_space<vmem>>) attributes {dimension_semantics = [#tpu.dimension_semantics<parallel>, #tpu.dimension_semantics<arbitrary>], iteration_bounds = array<i64: 1, 1>, scalar_prefetch = 0 : i64, scratch_operands = 1 : i64, tpu.core_type = #tpu.core_type<tc>, window_params = [{transform_indices = @transform_0, window_bounds = array<i64: 128, 256>}, {transform_indices = @transform_1, window_bounds = array<i64: 256, 8>}, {pipeline_mode = #tpu.pipeline_mode<synchronous>, transform_indices = @transform_2, window_bounds = array<i64: 1, 8>}, {pipeline_mode = #tpu.pipeline_mode<synchronous>, transform_indices = @transform_3, window_bounds = array<i64: 1, 8>}, {transform_indices = @transform_4, window_bounds = array<i64: 128, 8>}]} {
    %c0_i32 = arith.constant 0 : i32
    %0 = arith.cmpi eq, %arg1, %c0_i32 : i32
    %1 = arith.extui %0 : i1 to i32
    %c0_i32_0 = arith.constant 0 : i32
    %2 = arith.cmpi ne, %1, %c0_i32_0 : i32
    scf.if %2 {
      %cst_10 = arith.constant 0.000000e+00 : f32
      %12 = vector.broadcast %cst_10 : f32 to vector<128x8xf32>
      %c0_11 = arith.constant 0 : index
      %c0_12 = arith.constant 0 : index
      %13 = vector.load %arg7[%c0_11, %c0_12] : memref<128x8xf32, #tpu.memory_space<vmem>>, vector<128x8xf32>
      tpu.vector_store %arg7[%c0_11, %c0_12], %12 {strides = array<i32>} : memref<128x8xf32, #tpu.memory_space<vmem>>, vector<128x8xf32>,
    } else {
    }
    %c0 = arith.constant 0 : index
    %c0_1 = arith.constant 0 : index
    %3 = vector.load %arg7[%c0, %c0_1] : memref<128x8xf32, #tpu.memory_space<vmem>>, vector<128x8xf32>
    %c0_2 = arith.constant 0 : index
    %c0_3 = arith.constant 0 : index
    %4 = vector.load %arg2[%c0_2, %c0_3] : memref<128x256xf32, #tpu.memory_space<vmem>>, vector<128x256xf32>
    %c0_4 = arith.constant 0 : index
    %c0_5 = arith.constant 0 : index
    %5 = vector.load %arg3[%c0_4, %c0_5] : memref<256x8xf32, #tpu.memory_space<vmem>>, vector<256x8xf32>
    %cst = arith.constant dense<0.000000e+00> : vector<128x8xf32>
    %6 = tpu.matmul %4, %5, %cst {dimension_numbers = #tpu.dot_dimension_numbers<[1], [0], [0], [1], [0, 0, 1, 1], [], []>} : vector<128x256xf32>, vector<256x8xf32>, vector<128x8xf32> -> vector<128x8xf32>
    %7 = arith.addf %3, %6 : vector<128x8xf32>
    %c0_6 = arith.constant 0 : index
    %c0_7 = arith.constant 0 : index
    %8 = vector.load %arg7[%c0_6, %c0_7] : memref<128x8xf32, #tpu.memory_space<vmem>>, vector<128x8xf32>
    tpu.vector_store %arg7[%c0_6, %c0_7], %7 {strides = array<i32>} : memref<128x8xf32, #tpu.memory_space<vmem>>, vector<128x8xf32>,
    %c0_i32_8 = arith.constant 0 : i32
    %9 = arith.cmpi eq, %arg1, %c0_i32_8 : i32
    %10 = arith.extui %9 : i1 to i32
    %c0_i32_9 = arith.constant 0 : i32
    %11 = arith.cmpi ne, %10, %c0_i32_9 : i32
    scf.if %11 {
      %c0_10 = arith.constant 0 : index
      %c0_11 = arith.constant 0 : index
      %12 = vector.load %arg7[%c0_10, %c0_11] : memref<128x8xf32, #tpu.memory_space<vmem>>, vector<128x8xf32>
      %c0_12 = arith.constant 0 : index
      %c0_13 = arith.constant 0 : index
      %13 = vector.load %arg4[%c0_12, %c0_13] : memref<1x8xf32, #tpu.memory_space<vmem>>, vector<1x8xf32>
      %14 = vector.broadcast %13 : vector<1x8xf32> to vector<128x8xf32>
      %15 = arith.mulf %12, %14 : vector<128x8xf32>
      %c0_14 = arith.constant 0 : index
      %c0_15 = arith.constant 0 : index
      %16 = vector.load %arg5[%c0_14, %c0_15] : memref<1x8xf32, #tpu.memory_space<vmem>>, vector<1x8xf32>
      %17 = vector.broadcast %16 : vector<1x8xf32> to vector<128x8xf32>
      %18 = arith.addf %15, %17 : vector<128x8xf32>
      %cst_16 = arith.constant 0.000000e+00 : f32
      %19 = vector.broadcast %cst_16 : f32 to vector<128x8xf32>
      %20 = arith.maximumf %18, %19 : vector<128x8xf32>
      %c0_17 = arith.constant 0 : index
      %c0_18 = arith.constant 0 : index
      %21 = vector.load %arg6[%c0_17, %c0_18] : memref<128x8xf32, #tpu.memory_space<vmem>>, vector<128x8xf32>
      tpu.vector_store %arg6[%c0_17, %c0_18], %20 {strides = array<i32>} : memref<128x8xf32, #tpu.memory_space<vmem>>, vector<128x8xf32>,
    } else {
    }
    return
  }
  func.func @transform_0(%arg0: i32, %arg1: i32) -> (i32, i32) {
    %c0_i32 = arith.constant 0 : i32
    return %arg0, %arg1 : i32, i32
  }
  func.func @transform_1(%arg0: i32, %arg1: i32) -> (i32, i32) {
    %c0_i32 = arith.constant 0 : i32
    %c0_i32_0 = arith.constant 0 : i32
    return %arg1, %c0_i32 : i32, i32
  }
  func.func @transform_2(%arg0: i32, %arg1: i32) -> (i32, i32) {
    %c0_i32 = arith.constant 0 : i32
    %c0_i32_0 = arith.constant 0 : i32
    %c0_i32_1 = arith.constant 0 : i32
    return %c0_i32, %c0_i32_0 : i32, i32
  }
  func.func @transform_3(%arg0: i32, %arg1: i32) -> (i32, i32) {
    %c0_i32 = arith.constant 0 : i32
    %c0_i32_0 = arith.constant 0 : i32
    %c0_i32_1 = arith.constant 0 : i32
    return %c0_i32, %c0_i32_0 : i32, i32
  }
  func.func @transform_4(%arg0: i32, %arg1: i32) -> (i32, i32) {
    %c0_i32 = arith.constant 0 : i32
    %c0_i32_0 = arith.constant 0 : i32
    return %arg0, %c0_i32 : i32, i32
  }
}

</mosaic_0001>

<bundles_post_ra>
// kernel: down_forward.3
= control target key start
LH: loop header
LB: loop body
LE: loop exit
PB: predicated region body
PF: predicated region fallthrough
CT: control target
= control target key end

     0   :  { %vm129_vm0 = vcmask 31744   ;;  %s431_s0 = inlined_call_operand.vmem [shape: f32[128,4], index: 0, kind: input, shape index: {}]   ;;  %s432_s1 = inlined_call_operand.vmem [shape: f32[128,4], index: 1, kind: input, shape index: {}]   ;;  %s433_s2 = inlined_call_operand.vmem [shape: f32[128,4], index: 2, kind: input, shape index: {}]   ;;  %s434_s3 = inlined_call_operand.vmem [shape: f32[128,4], index: 3, kind: input, shape index: {}]   ;;  %s435_s4 = inlined_call_operand.vmem [shape: f32[128,4], index: 4, kind: output, shape index: {}]  }
   0x1   :  { %v17_v0 = vld [vmem:[%s431_s0] sm:$0xff]  ;;  %v18_v5 = vld [vmem:[%s431_s0 + $0x8] sm:$0xff]  ;;  %v19_v11 = vld [vmem:[%s431_s0 + $0x10] sm:$0xff] }
   0x2   :  { %v33_v1 = vld [vmem:[%s432_s1] sm:$0xff]  ;;  %v34_v6 = vld [vmem:[%s432_s1 + $0x8] sm:$0xff]  ;;  %v35_v13 = vld [vmem:[%s432_s1 + $0x10] sm:$0xff] }
   0x3   :  { %v65_v2 = vld [vmem:[%s433_s2] sm:$0xff]  ;;  %v49_v3 = vmax.f32 %v17_v0, %v33_v1  ;;  %v50_v8 = vmax.f32 %v18_v5, %v34_v6  ;;  %v66_v9 = vld [vmem:[%s433_s2 + $0x8] sm:$0xff]  ;;  %v67_v14 = vld [vmem:[%s433_s2 + $0x10] sm:$0xff]  ;;  %v51_v17 = vmax.f32 %v19_v11, %v35_v13 }
   0x4   :  { %v81_v4 = vld [vmem:[%s434_s3] sm:$0xff]  ;;  %v82_v10 = vld [vmem:[%s434_s3 + $0x8] sm:$0xff]  ;;  %v83_v15 = vld [vmem:[%s434_s3 + $0x10] sm:$0xff] }
   0x5   :  { %v97_v7 = vmax.f32 %v65_v2, %v81_v4  ;;  %v98_v12 = vmax.f32 %v66_v9, %v82_v10  ;;  %v99_v18 = vmax.f32 %v67_v14, %v83_v15  ;;  %v20_v19 = vld [vmem:[%s431_s0 + $0x18] sm:$0xff]  ;;  %v21_v25 = vld [vmem:[%s431_s0 + $0x20] sm:$0xff]  ;;  %v22_v32 = vld [vmem:[%s431_s0 + $0x28] sm:$0xff] }
   0x6   :  { %v36_v20 = vld [vmem:[%s432_s1 + $0x18] sm:$0xff]  ;;  %v37_v26 = vld [vmem:[%s432_s1 + $0x20] sm:$0xff]  ;;  %v38_v34 = vld [vmem:[%s432_s1 + $0x28] sm:$0xff] }
   0x7   :  { %v113_v16 = vmax.f32 %v49_v3, %v97_v7  ;;  %v68_v21 = vld [vmem:[%s433_s2 + $0x18] sm:$0xff]  ;;  %v114_v22 = vmax.f32 %v50_v8, %v98_v12  ;;  %v52_v23 = vmax.f32 %v20_v19, %v36_v20  ;;  %v115_v27 = vmax.f32 %v51_v17, %v99_v18  ;;  %v69_v30 = vld [vmem:[%s433_s2 + $0x20] sm:$0xff]  ;;  %v70_v35 = vld [vmem:[%s433_s2 + $0x28] sm:$0xff] }
   0x8   :  { %v84_v24 = vld [vmem:[%s434_s3 + $0x18] sm:$0xff]  ;;  %v53_v29 = vmax.f32 %v21_v25, %v37_v26  ;;  %v85_v31 = vld [vmem:[%s434_s3 + $0x20] sm:$0xff]  ;;  %v86_v36 = vld [vmem:[%s434_s3 + $0x28] sm:$0xff]  ;;  %v54_v38 = vmax.f32 %v22_v32, %v38_v34 }
   0x9   :  { %130 = vst.msk [vmem:[%s435_s4] sm:$0xff] %vm129_vm0, %v113_v16  ;;  %v100_v28 = vmax.f32 %v68_v21, %v84_v24  ;;  %131 = vst.msk [vmem:[%s435_s4 + $0x8] sm:$0xff] %vm129_vm0, %v114_v22  ;;  %v101_v33 = vmax.f32 %v69_v30, %v85_v31  ;;  %v102_v39 = vmax.f32 %v70_v35, %v86_v36  ;;  %v23_v40 = vld [vmem:[%s431_s0 + $0x30] sm:$0xff]  ;;  %v24_v46 = vld [vmem:[%s431_s0 + $0x38] sm:$0xff] }
   0xa   :  { %132 = vst.msk [vmem:[%s435_s4 + $0x10] sm:$0xff] %vm129_vm0, %v115_v27  ;;  %v39_v41 = vld [vmem:[%s432_s1 + $0x30] sm:$0xff]  ;;  %v40_v47 = vld [vmem:[%s432_s1 + $0x38] sm:$0xff]  ;;  %v25_v53 = vld [vmem:[%s431_s0 + $0x40] sm:$0xff] }
   0xb   :  { %v116_v37 = vmax.f32 %v52_v23, %v100_v28  ;;  %v71_v42 = vld [vmem:[%s433_s2 + $0x30] sm:$0xff]  ;;  %v117_v43 = vmax.f32 %v53_v29, %v101_v33  ;;  %v55_v44 = vmax.f32 %v23_v40, %v39_v41  ;;  %v118_v48 = vmax.f32 %v54_v38, %v102_v39  ;;  %v72_v51 = vld [vmem:[%s433_s2 + $0x38] sm:$0xff]  ;;  %v41_v55 = vld [vmem:[%s432_s1 + $0x40] sm:$0xff] }
   0xc   :  { %v87_v45 = vld [vmem:[%s434_s3 + $0x30] sm:$0xff]  ;;  %v56_v50 = vmax.f32 %v24_v46, %v40_v47  ;;  %v88_v52 = vld [vmem:[%s434_s3 + $0x38] sm:$0xff]  ;;  %v73_v56 = vld [vmem:[%s433_s2 + $0x40] sm:$0xff]  ;;  %v57_v59 = vmax.f32 %v25_v53, %v41_v55 }
   0xd   :  { %133 = vst.msk [vmem:[%s435_s4 + $0x18] sm:$0xff] %vm129_vm0, %v116_v37  ;;  %v103_v49 = vmax.f32 %v71_v42, %v87_v45  ;;  %134 = vst.msk [vmem:[%s435_s4 + $0x20] sm:$0xff] %vm129_vm0, %v117_v43  ;;  %v104_v54 = vmax.f32 %v72_v51, %v88_v52  ;;  %v89_v57 = vld [vmem:[%s434_s3 + $0x40] sm:$0xff]  ;;  %v26_v61 = vld [vmem:[%s431_s0 + $0x48] sm:$0xff] }
   0xe   :  { %135 = vst.msk [vmem:[%s435_s4 + $0x28] sm:$0xff] %vm129_vm0, %v118_v48  ;;  %v105_v60 = vmax.f32 %v73_v56, %v89_v57  ;;  %v42_v62 = vld [vmem:[%s432_s1 + $0x48] sm:$0xff]  ;;  %v27_v3 = vld [vmem:[%s431_s0 + $0x50] sm:$0xff]  ;;  %v28_v10 = vld [vmem:[%s431_s0 + $0x58] sm:$0xff] }
   0xf   :  { %v119_v58 = vmax.f32 %v55_v44, %v103_v49  ;;  %v74_v63 = vld [vmem:[%s433_s2 + $0x48] sm:$0xff]  ;;  %v120_v0 = vmax.f32 %v56_v50, %v104_v54  ;;  %v58_v1 = vmax.f32 %v26_v61, %v42_v62  ;;  %v43_v4 = vld [vmem:[%s432_s1 + $0x50] sm:$0xff]  ;;  %v44_v12 = vld [vmem:[%s432_s1 + $0x58] sm:$0xff] }
  0x10   :  { %v90_v2 = vld [vmem:[%s434_s3 + $0x48] sm:$0xff]  ;;  %v121_v5 = vmax.f32 %v57_v59, %v105_v60  ;;  %v59_v7 = vmax.f32 %v27_v3, %v43_v4  ;;  %v75_v8 = vld [vmem:[%s433_s2 + $0x50] sm:$0xff]  ;;  %v76_v13 = vld [vmem:[%s433_s2 + $0x58] sm:$0xff]  ;;  %v60_v16 = vmax.f32 %v28_v10, %v44_v12 }
  0x11   :  { %136 = vst.msk [vmem:[%s435_s4 + $0x30] sm:$0xff] %vm129_vm0, %v119_v58  ;;  %v106_v6 = vmax.f32 %v74_v63, %v90_v2  ;;  %v91_v9 = vld [vmem:[%s434_s3 + $0x50] sm:$0xff]  ;;  %137 = vst.msk [vmem:[%s435_s4 + $0x38] sm:$0xff] %vm129_vm0, %v120_v0  ;;  %v92_v14 = vld [vmem:[%s434_s3 + $0x58] sm:$0xff] }
  0x12   :  { %v107_v11 = vmax.f32 %v75_v8, %v91_v9  ;;  %138 = vst.msk [vmem:[%s435_s4 + $0x40] sm:$0xff] %vm129_vm0, %v121_v5  ;;  %v108_v17 = vmax.f32 %v76_v13, %v92_v14  ;;  %v29_v18 = vld [vmem:[%s431_s0 + $0x60] sm:$0xff]  ;;  %v30_v24 = vld [vmem:[%s431_s0 + $0x68] sm:$0xff]  ;;  %v31_v31 = vld [vmem:[%s431_s0 + $0x70] sm:$0xff] }
  0x13   :  { %v122_v15 = vmax.f32 %v58_v1, %v106_v6  ;;  %v45_v19 = vld [vmem:[%s432_s1 + $0x60] sm:$0xff]  ;;  %v46_v25 = vld [vmem:[%s432_s1 + $0x68] sm:$0xff]  ;;  %v47_v33 = vld [vmem:[%s432_s1 + $0x70] sm:$0xff] }
  0x14   :  { %v77_v20 = vld [vmem:[%s433_s2 + $0x60] sm:$0xff]  ;;  %v123_v21 = vmax.f32 %v59_v7, %v107_v11  ;;  %v61_v22 = vmax.f32 %v29_v18, %v45_v19  ;;  %v124_v26 = vmax.f32 %v60_v16, %v108_v17  ;;  %v62_v28 = vmax.f32 %v30_v24, %v46_v25  ;;  %v78_v29 = vld [vmem:[%s433_s2 + $0x68] sm:$0xff]  ;;  %v79_v34 = vld [vmem:[%s433_s2 + $0x70] sm:$0xff] }
  0x15   :  { %v93_v23 = vld [vmem:[%s434_s3 + $0x60] sm:$0xff]  ;;  %139 = vst.msk [vmem:[%s435_s4 + $0x48] sm:$0xff] %vm129_vm0, %v122_v15  ;;  %v94_v30 = vld [vmem:[%s434_s3 + $0x68] sm:$0xff]  ;;  %v95_v35 = vld [vmem:[%s434_s3 + $0x70] sm:$0xff]  ;;  %v63_v37 = vmax.f32 %v31_v31, %v47_v33 }
  0x16   :  { %v109_v27 = vmax.f32 %v77_v20, %v93_v23  ;;  %140 = vst.msk [vmem:[%s435_s4 + $0x50] sm:$0xff] %vm129_vm0, %v123_v21  ;;  %v110_v32 = vmax.f32 %v78_v29, %v94_v30  ;;  %141 = vst.msk [vmem:[%s435_s4 + $0x58] sm:$0xff] %vm129_vm0, %v124_v26  ;;  %v111_v38 = vmax.f32 %v79_v34, %v95_v35  ;;  %v32_v39 = vld [vmem:[%s431_s0 + $0x78] sm:$0xff] }
  0x17   :  { %v48_v40 = vld [vmem:[%s432_s1 + $0x78] sm:$0xff] }
  0x18   :  { %v125_v36 = vmax.f32 %v61_v22, %v109_v27  ;;  %v80_v41 = vld [vmem:[%s433_s2 + $0x78] sm:$0xff]  ;;  %v126_v42 = vmax.f32 %v62_v28, %v110_v32  ;;  %v64_v43 = vmax.f32 %v32_v39, %v48_v40  ;;  %v127_v45 = vmax.f32 %v63_v37, %v111_v38 }
  0x19   :  { %v96_v44 = vld [vmem:[%s434_s3 + $0x78] sm:$0xff] }
  0x1a   :  { %142 = vst.msk [vmem:[%s435_s4 + $0x60] sm:$0xff] %vm129_vm0, %v125_v36  ;;  %v112_v46 = vmax.f32 %v80_v41, %v96_v44  ;;  %143 = vst.msk [vmem:[%s435_s4 + $0x68] sm:$0xff] %vm129_vm0, %v126_v42 }
  0x1b   :  { %144 = vst.msk [vmem:[%s435_s4 + $0x70] sm:$0xff] %vm129_vm0, %v127_v45 }
  0x1c   :  { %v128_v47 = vmax.f32 %v64_v43, %v112_v46 }
  0x1e   :  { %145 = vst.msk [vmem:[%s435_s4 + $0x78] sm:$0xff] %vm129_vm0, %v128_v47 }

// kernel: down_forward.4
= control target key start
LH: loop header
LB: loop body
LE: loop exit
PB: predicated region body
PF: predicated region fallthrough
CT: control target
= control target key end

     0   :  { %vm21_vm0 = vcmask 64512   ;;  %v504_v3 = vmov 0.0   ;;  %s764_s1 = inlined_call_operand.vmem [shape: f32[128,8], index: 1, kind: input, shape index: {}]   ;;  %s765_s0 = inlined_call_operand.vmem [shape: f32[128,128], index: 0, kind: input, shape index: {}]   ;;  %s766_s2 = inlined_call_operand.vmem [shape: f32[1,8], index: 2, kind: input, shape index: {}]   ;;  %s767_s3 = inlined_call_operand.vmem [shape: f32[1,8], index: 3, kind: input, shape index: {}]   ;;  %s768_s4 = inlined_call_operand.vmem [shape: f32[128,8], index: 4, kind: output, shape index: {}]  }
   0x1   :  { %v70_v0 = vld [vmem:[%s764_s1] sm:$0xff]  ;;  %v71_v1 = vld [vmem:[%s764_s1 + $0x8] sm:$0xff]  ;;  %v72_v2 = vld [vmem:[%s764_s1 + $0x10] sm:$0xff]  ;;  %23 = vst.msk [vmem:[#allocation2 + $0x8] sm:$0xff] %vm21_vm0, %v504_v3 }
   0x2   :  { %22 = vst.msk [vmem:[#allocation2] sm:$0xff] %vm21_vm0, %v504_v3  ;;  %24 = vst.msk [vmem:[#allocation2 + $0x10] sm:$0xff] %vm21_vm0, %v504_v3  ;;  %v455_v4 = vpack.c.bf16 %v71_v1, %v70_v0  ;;  %v73_v5 = vld [vmem:[%s764_s1 + $0x18] sm:$0xff]  ;;  %v74_v7 = vld [vmem:[%s764_s1 + $0x20] sm:$0xff] }
   0x3   :  { %25 = vst.msk [vmem:[#allocation2 + $0x18] sm:$0xff] %vm21_vm0, %v504_v3  ;;  %26 = vst.msk [vmem:[#allocation2 + $0x20] sm:$0xff] %vm21_vm0, %v504_v3  ;;  %v459_v6 = vpack.c.bf16 %v73_v5, %v72_v2  ;;  %v75_v8 = vld [vmem:[%s764_s1 + $0x28] sm:$0xff]  ;;  %v54_v10 = vld [vmem:[%s765_s0] sm:$0xff] }
   0x4   :  { %27 = vst.msk [vmem:[#allocation2 + $0x28] sm:$0xff] %vm21_vm0, %v504_v3  ;;  %28 = vst.msk [vmem:[#allocation2 + $0x30] sm:$0xff] %vm21_vm0, %v504_v3  ;;  %456 = vmatprep.subr.bf16.mxu0 %v455_v4  ;;  %487 = vmatprep.subr.bf16.mxu1 %v455_v4  ;;  %v463_v9 = vpack.c.bf16 %v75_v8, %v74_v7  ;;  %v62_v11 = vld [vmem:[%s765_s0 + $0x40] sm:$0xff]  ;;  %v76_v12 = vld [vmem:[%s764_s1 + $0x30] sm:$0xff] }
   0x5   :  { %29 = vst.msk [vmem:[#allocation2 + $0x38] sm:$0xff] %vm21_vm0, %v504_v3  ;;  %30 = vst.msk [vmem:[#allocation2 + $0x40] sm:$0xff] %vm21_vm0, %v504_v3  ;;  %458 = vmatpush3.bf16.msra.mxu0 %v455_v4  ;;  %495 = vmatpush3.bf16.msra.mxu1 %v455_v4  ;;  %v77_v13 = vld [vmem:[%s764_s1 + $0x38] sm:$0xff]  ;;  %v78_v15 = vld [vmem:[%s764_s1 + $0x40] sm:$0xff] }
   0x6   :  { %31 = vst.msk [vmem:[#allocation2 + $0x48] sm:$0xff] %vm21_vm0, %v504_v3  ;;  %32 = vst.msk [vmem:[#allocation2 + $0x50] sm:$0xff] %vm21_vm0, %v504_v3  ;;  %460 = vmatprep.subr.bf16.mxu0 %v459_v6  ;;  %488 = vmatprep.subr.bf16.mxu1 %v459_v6  ;;  %v467_v14 = vpack.c.bf16 %v77_v13, %v76_v12  ;;  %v79_v16 = vld [vmem:[%s764_s1 + $0x48] sm:$0xff]  ;;  %v80_v18 = vld [vmem:[%s764_s1 + $0x50] sm:$0xff] }
   0x7   :  { %33 = vst.msk [vmem:[#allocation2 + $0x58] sm:$0xff] %vm21_vm0, %v504_v3  ;;  %34 = vst.msk [vmem:[#allocation2 + $0x60] sm:$0xff] %vm21_vm0, %v504_v3  ;;  %431 = vmatprep.mubr.f32.mxu0 %v54_v10  ;;  %443 = vmatprep.mubr.f32.mxu1 %v62_v11  ;;  %v471_v17 = vpack.c.bf16 %v79_v16, %v78_v15  ;;  %v81_v19 = vld [vmem:[%s764_s1 + $0x58] sm:$0xff]  ;;  %v82_v21 = vld [vmem:[%s764_s1 + $0x60] sm:$0xff] }
   0x8   :  { %35 = vst.msk [vmem:[#allocation2 + $0x68] sm:$0xff] %vm21_vm0, %v504_v3  ;;  %36 = vst.msk [vmem:[#allocation2 + $0x70] sm:$0xff] %vm21_vm0, %v504_v3  ;;  %v475_v20 = vpack.c.bf16 %v81_v19, %v80_v18  ;;  %v83_v22 = vld [vmem:[%s764_s1 + $0x68] sm:$0xff]  ;;  %v84_v24 = vld [vmem:[%s764_s1 + $0x70] sm:$0xff] }
   0x9   :  { %37 = vst.msk [vmem:[#allocation2 + $0x78] sm:$0xff] %vm21_vm0, %v504_v3  ;;  %462 = vmatpush3.bf16.msra.mxu0 %v459_v6  ;;  %496 = vmatpush3.bf16.msra.mxu1 %v459_v6  ;;  %v479_v23 = vpack.c.bf16 %v83_v22, %v82_v21  ;;  %v85_v25 = vld [vmem:[%s764_s1 + $0x78] sm:$0xff]  ;;  %v55_v27 = vld [vmem:[%s765_s0 + $0x8] sm:$0xff]  ;;  %v56_v29 = vld [vmem:[%s765_s0 + $0x10] sm:$0xff] }
   0xa   :  { %464 = vmatprep.subr.bf16.mxu0 %v463_v9  ;;  %489 = vmatprep.subr.bf16.mxu1 %v463_v9  ;;  %v483_v26 = vpack.c.bf16 %v85_v25, %v84_v24  ;;  %v63_v28 = vld [vmem:[%s765_s0 + $0x48] sm:$0xff]  ;;  %v64_v30 = vld [vmem:[%s765_s0 + $0x50] sm:$0xff]  ;;  %v57_v31 = vld [vmem:[%s765_s0 + $0x18] sm:$0xff] }
   0xb   :  { %v65_v32 = vld [vmem:[%s765_s0 + $0x58] sm:$0xff]  ;;  %v58_v33 = vld [vmem:[%s765_s0 + $0x20] sm:$0xff]  ;;  %v59_v35 = vld [vmem:[%s765_s0 + $0x28] sm:$0xff] }
   0xc   :  { %v66_v34 = vld [vmem:[%s765_s0 + $0x60] sm:$0xff]  ;;  %v67_v36 = vld [vmem:[%s765_s0 + $0x68] sm:$0xff]  ;;  %v60_v37 = vld [vmem:[%s765_s0 + $0x30] sm:$0xff] }
   0xd   :  { %466 = vmatpush3.bf16.msra.mxu0 %v463_v9  ;;  %497 = vmatpush3.bf16.msra.mxu1 %v463_v9  ;;  %v68_v38 = vld [vmem:[%s765_s0 + $0x70] sm:$0xff]  ;;  %v61_v39 = vld [vmem:[%s765_s0 + $0x38] sm:$0xff]  ;;  %v39_v41 = vld [vmem:[#allocation2 + $0x8] sm:$0xff] }
   0xe   :  { %468 = vmatprep.subr.bf16.mxu0 %v467_v14  ;;  %490 = vmatprep.subr.bf16.mxu1 %v467_v14  ;;  %v69_v40 = vld [vmem:[%s765_s0 + $0x78] sm:$0xff]  ;;  %v47_v42 = vld [vmem:[#allocation2 + $0x48] sm:$0xff]  ;;  %v38_v43 = vld [vmem:[#allocation2] sm:$0xff] }
   0xf   :  { %v46_v44 = vld [vmem:[#allocation2 + $0x40] sm:$0xff]  ;;  %v41_v53 = vld [vmem:[#allocation2 + $0x18] sm:$0xff]  ;;  %v40_v55 = vld [vmem:[#allocation2 + $0x10] sm:$0xff] }
  0x10   :  { %v49_v54 = vld [vmem:[#allocation2 + $0x58] sm:$0xff]  ;;  %v48_v56 = vld [vmem:[#allocation2 + $0x50] sm:$0xff]  ;;  %v43_v1 = vld [vmem:[#allocation2 + $0x28] sm:$0xff] }
  0x11   :  { %470 = vmatpush3.bf16.msra.mxu0 %v467_v14  ;;  %498 = vmatpush3.bf16.msra.mxu1 %v467_v14  ;;  %v51_v2 = vld [vmem:[#allocation2 + $0x68] sm:$0xff]  ;;  %v42_v3 = vld [vmem:[#allocation2 + $0x20] sm:$0xff]  ;;  %v45_v13 = vld [vmem:[#allocation2 + $0x38] sm:$0xff] }
  0x12   :  { %472 = vmatprep.subr.bf16.mxu0 %v471_v17  ;;  %491 = vmatprep.subr.bf16.mxu1 %v471_v17  ;;  %v50_v4 = vld [vmem:[#allocation2 + $0x60] sm:$0xff]  ;;  %v53_v14 = vld [vmem:[#allocation2 + $0x78] sm:$0xff]  ;;  %v44_v19 = vld [vmem:[#allocation2 + $0x30] sm:$0xff] }
  0x13   :  { %v651_v5 = vld [vmem:[%s766_s2] ss:$0 sm:$0xff]  ;;  %v52_v24 = vld [vmem:[#allocation2 + $0x70] sm:$0xff] }
  0x14   :  { %v658_v8 = vld [vmem:[%s767_s3] ss:$0 sm:$0xff] }
  0x15   :  { %474 = vmatpush3.bf16.msra.mxu0 %v471_v17  ;;  %499 = vmatpush3.bf16.msra.mxu1 %v471_v17 }
  0x16   :  { %476 = vmatprep.subr.bf16.mxu0 %v475_v20  ;;  %492 = vmatprep.subr.bf16.mxu1 %v475_v20 }
  0x19   :  { %478 = vmatpush3.bf16.msra.mxu0 %v475_v20  ;;  %500 = vmatpush3.bf16.msra.mxu1 %v475_v20 }
  0x1a   :  { %480 = vmatprep.subr.bf16.mxu0 %v479_v23  ;;  %493 = vmatprep.subr.bf16.mxu1 %v479_v23 }
  0x1d   :  { %482 = vmatpush3.bf16.msra.mxu0 %v479_v23  ;;  %501 = vmatpush3.bf16.msra.mxu1 %v479_v23 }
  0x1e   :  { %484 = vmatprep.subr.bf16.mxu0 %v483_v26  ;;  %494 = vmatprep.subr.bf16.mxu1 %v483_v26 }
  0x21   :  { %486 = vmatpush3.bf16.msra.mxu0 %v483_v26  ;;  %502 = vmatpush3.bf16.msra.mxu1 %v483_v26 }
  0x24   :  { %432 = vmatmul.mubr.f32.vlgmr.msra.gmra.mrb[0].mxu0 %v55_v27  ;;  %444 = vmatmul.mubr.f32.vlgmr.msra.gmra.mrb[0].mxu1 %v63_v28 }
  0x25   :  { %434 = vmatprep.mubr.f32.mxu0 %v56_v29  ;;  %446 = vmatprep.mubr.f32.mxu1 %v64_v30 }
  0x28   :  { %435 = vmatmul.mubr.f32.gmra.mrb[2].mxu0 %v57_v31  ;;  %447 = vmatmul.mubr.f32.gmra.mrb[2].mxu1 %v65_v32 }
  0x29   :  { %437 = vmatprep.mubr.f32.mxu0 %v58_v33  ;;  %449 = vmatprep.mubr.f32.mxu1 %v66_v34 }
  0x2c   :  { %438 = vmatmul.mubr.f32.gmra.mrb[4].mxu0 %v59_v35  ;;  %450 = vmatmul.mubr.f32.gmra.mrb[4].mxu1 %v67_v36 }
  0x2d   :  { %440 = vmatprep.mubr.f32.mxu0 %v60_v37  ;;  %452 = vmatprep.mubr.f32.mxu1 %v68_v38 }
  0x30   :  { %441 = vmatmul.mubr.f32.gmra.mrb[6].mxu0 %v61_v39  ;;  %453 = vmatmul.mubr.f32.gmra.mrb[6].mxu1 %v69_v40 }
  0xf7   :  { %v433_v45 = vpop.f32.mrb[0].mxu0  ;;  %v445_v46 = vpop.f32.mrb[0].mxu1 }
  0xf8   :  { %v232_v47 = vadd.f32 %v433_v45, %v39_v41  ;;  %v240_v48 = vadd.f32 %v445_v46, %v47_v42  ;;  %v152_v49 = vpop.f32.mrb[1].mxu0  ;;  %v192_v50 = vpop.f32.mrb[1].mxu1 }
  0xf9   :  { %v231_v51 = vadd.f32 %v152_v49, %v38_v43  ;;  %v239_v52 = vadd.f32 %v192_v50, %v46_v44 }
  0xfa   :  { %249 = vst.msk [vmem:[#allocation2 + $0x8] sm:$0xff] %vm21_vm0, %v232_v47  ;;  %257 = vst.msk [vmem:[#allocation2 + $0x48] sm:$0xff] %vm21_vm0, %v240_v48 }
  0xfb   :  { %248 = vst.msk [vmem:[#allocation2] sm:$0xff] %vm21_vm0, %v231_v51  ;;  %256 = vst.msk [vmem:[#allocation2 + $0x40] sm:$0xff] %vm21_vm0, %v239_v52  ;;  %v436_v57 = vpop.f32.mrb[2].mxu0  ;;  %v448_v58 = vpop.f32.mrb[2].mxu1 }
  0xfc   :  { %v234_v59 = vadd.f32 %v436_v57, %v41_v53  ;;  %v242_v60 = vadd.f32 %v448_v58, %v49_v54  ;;  %v162_v61 = vpop.f32.mrb[3].mxu0  ;;  %v202_v62 = vpop.f32.mrb[3].mxu1 }
  0xfd   :  { %v233_v63 = vadd.f32 %v162_v61, %v40_v55  ;;  %v241_v0 = vadd.f32 %v202_v62, %v48_v56 }
  0xfe   :  { %251 = vst.msk [vmem:[#allocation2 + $0x18] sm:$0xff] %vm21_vm0, %v234_v59  ;;  %259 = vst.msk [vmem:[#allocation2 + $0x58] sm:$0xff] %vm21_vm0, %v242_v60 }
  0xff   :  { %250 = vst.msk [vmem:[#allocation2 + $0x10] sm:$0xff] %vm21_vm0, %v233_v63  ;;  %258 = vst.msk [vmem:[#allocation2 + $0x50] sm:$0xff] %vm21_vm0, %v241_v0  ;;  %v439_v6 = vpop.f32.mrb[4].mxu0  ;;  %v451_v7 = vpop.f32.mrb[4].mxu1 }
 0x100   :  { %v236_v9 = vadd.f32 %v439_v6, %v43_v1  ;;  %v244_v10 = vadd.f32 %v451_v7, %v51_v2  ;;  %v172_v11 = vpop.f32.mrb[5].mxu0  ;;  %v212_v12 = vpop.f32.mrb[5].mxu1 }
 0x101   :  { %v268_v15 = vld [vmem:[#allocation2 + $0x8] sm:$0xff]  ;;  %v235_v17 = vadd.f32 %v172_v11, %v42_v3  ;;  %v243_v18 = vadd.f32 %v212_v12, %v50_v4 }
 0x102   :  { %v276_v16 = vld [vmem:[#allocation2 + $0x48] sm:$0xff]  ;;  %v291_v20 = vmul.f32 %v651_v5, %v268_v15  ;;  %v267_v22 = vld [vmem:[#allocation2] sm:$0xff]  ;;  %253 = vst.msk [vmem:[#allocation2 + $0x28] sm:$0xff] %vm21_vm0, %v236_v9  ;;  %261 = vst.msk [vmem:[#allocation2 + $0x68] sm:$0xff] %vm21_vm0, %v244_v10 }
 0x103   :  { %v299_v21 = vmul.f32 %v651_v5, %v276_v16  ;;  %v275_v23 = vld [vmem:[#allocation2 + $0x40] sm:$0xff]  ;;  %v290_v25 = vmul.f32 %v651_v5, %v267_v22  ;;  %252 = vst.msk [vmem:[#allocation2 + $0x20] sm:$0xff] %vm21_vm0, %v235_v17  ;;  %260 = vst.msk [vmem:[#allocation2 + $0x60] sm:$0xff] %vm21_vm0, %v243_v18  ;;  %v442_v27 = vpop.f32.mrb[6].mxu0  ;;  %v454_v28 = vpop.f32.mrb[6].mxu1 }
 0x104   :  { %v298_v26 = vmul.f32 %v651_v5, %v275_v23  ;;  %v314_v29 = vadd.f32 %v658_v8, %v291_v20  ;;  %v238_v31 = vadd.f32 %v442_v27, %v45_v13  ;;  %v246_v32 = vadd.f32 %v454_v28, %v53_v14  ;;  %v182_v33 = vpop.f32.mrb[7].mxu0  ;;  %v222_v34 = vpop.f32.mrb[7].mxu1 }
 0x105   :  { %v322_v30 = vadd.f32 %v658_v8, %v299_v21  ;;  %v313_v35 = vadd.f32 %v658_v8, %v290_v25  ;;  %v270_v37 = vld [vmem:[#allocation2 + $0x18] sm:$0xff]  ;;  %v237_v39 = vadd.f32 %v182_v33, %v44_v19  ;;  %v245_v40 = vadd.f32 %v222_v34, %v52_v24 }
 0x106   :  { %v321_v36 = vadd.f32 %v658_v8, %v298_v26  ;;  %v278_v38 = vld [vmem:[#allocation2 + $0x58] sm:$0xff]  ;;  %v330_v41 = vmax.f32 %v314_v29, 0.0  ;;  %v293_v43 = vmul.f32 %v651_v5, %v270_v37  ;;  %v269_v45 = vld [vmem:[#allocation2 + $0x10] sm:$0xff]  ;;  %255 = vst.msk [vmem:[#allocation2 + $0x38] sm:$0xff] %vm21_vm0, %v238_v31  ;;  %263 = vst.msk [vmem:[#allocation2 + $0x78] sm:$0xff] %vm21_vm0, %v246_v32 }
 0x107   :  { %v338_v42 = vmax.f32 %v322_v30, 0.0  ;;  %v301_v44 = vmul.f32 %v651_v5, %v278_v38  ;;  %v277_v46 = vld [vmem:[#allocation2 + $0x50] sm:$0xff]  ;;  %v329_v47 = vmax.f32 %v313_v35, 0.0  ;;  %v292_v49 = vmul.f32 %v651_v5, %v269_v45  ;;  %254 = vst.msk [vmem:[#allocation2 + $0x30] sm:$0xff] %vm21_vm0, %v237_v39  ;;  %262 = vst.msk [vmem:[#allocation2 + $0x70] sm:$0xff] %vm21_vm0, %v245_v40 }
 0x108   :  { %v337_v48 = vmax.f32 %v321_v36, 0.0  ;;  %v300_v50 = vmul.f32 %v651_v5, %v277_v46  ;;  %346 = vst.msk [vmem:[%s768_s4 + $0x8] sm:$0xff] %vm21_vm0, %v330_v41  ;;  %v316_v51 = vadd.f32 %v658_v8, %v293_v43 }
 0x109   :  { %354 = vst.msk [vmem:[%s768_s4 + $0x48] sm:$0xff] %vm21_vm0, %v338_v42  ;;  %v324_v52 = vadd.f32 %v658_v8, %v301_v44  ;;  %345 = vst.msk [vmem:[%s768_s4] sm:$0xff] %vm21_vm0, %v329_v47  ;;  %v315_v53 = vadd.f32 %v658_v8, %v292_v49  ;;  %v272_v55 = vld [vmem:[#allocation2 + $0x28] sm:$0xff] }
 0x10a   :  { %353 = vst.msk [vmem:[%s768_s4 + $0x40] sm:$0xff] %vm21_vm0, %v337_v48  ;;  %v323_v54 = vadd.f32 %v658_v8, %v300_v50  ;;  %v280_v56 = vld [vmem:[#allocation2 + $0x68] sm:$0xff]  ;;  %v332_v57 = vmax.f32 %v316_v51, 0.0  ;;  %v295_v59 = vmul.f32 %v651_v5, %v272_v55  ;;  %v271_v61 = vld [vmem:[#allocation2 + $0x20] sm:$0xff] }
 0x10b   :  { %v340_v58 = vmax.f32 %v324_v52, 0.0  ;;  %v303_v60 = vmul.f32 %v651_v5, %v280_v56  ;;  %v279_v62 = vld [vmem:[#allocation2 + $0x60] sm:$0xff]  ;;  %v331_v63 = vmax.f32 %v315_v53, 0.0  ;;  %v294_v1 = vmul.f32 %v651_v5, %v271_v61 }
 0x10c   :  { %v339_v0 = vmax.f32 %v323_v54, 0.0  ;;  %v302_v2 = vmul.f32 %v651_v5, %v279_v62  ;;  %348 = vst.msk [vmem:[%s768_s4 + $0x18] sm:$0xff] %vm21_vm0, %v332_v57  ;;  %v318_v3 = vadd.f32 %v658_v8, %v295_v59 }
 0x10d   :  { %356 = vst.msk [vmem:[%s768_s4 + $0x58] sm:$0xff] %vm21_vm0, %v340_v58  ;;  %v326_v4 = vadd.f32 %v658_v8, %v303_v60  ;;  %347 = vst.msk [vmem:[%s768_s4 + $0x10] sm:$0xff] %vm21_vm0, %v331_v63  ;;  %v317_v6 = vadd.f32 %v658_v8, %v294_v1  ;;  %v274_v9 = vld [vmem:[#allocation2 + $0x38] sm:$0xff] }
 0x10e   :  { %355 = vst.msk [vmem:[%s768_s4 + $0x50] sm:$0xff] %vm21_vm0, %v339_v0  ;;  %v325_v7 = vadd.f32 %v658_v8, %v302_v2  ;;  %v282_v10 = vld [vmem:[#allocation2 + $0x78] sm:$0xff]  ;;  %v334_v11 = vmax.f32 %v318_v3, 0.0  ;;  %v297_v13 = vmul.f32 %v651_v5, %v274_v9  ;;  %v273_v15 = vld [vmem:[#allocation2 + $0x30] sm:$0xff] }
 0x10f   :  { %v342_v12 = vmax.f32 %v326_v4, 0.0  ;;  %v305_v14 = vmul.f32 %v651_v5, %v282_v10  ;;  %v281_v16 = vld [vmem:[#allocation2 + $0x70] sm:$0xff]  ;;  %v333_v17 = vmax.f32 %v317_v6, 0.0  ;;  %v296_v19 = vmul.f32 %v651_v5, %v273_v15 }
 0x110   :  { %v341_v18 = vmax.f32 %v325_v7, 0.0  ;;  %v304_v20 = vmul.f32 %v651_v5, %v281_v16  ;;  %350 = vst.msk [vmem:[%s768_s4 + $0x28] sm:$0xff] %vm21_vm0, %v334_v11  ;;  %v320_v21 = vadd.f32 %v658_v8, %v297_v13 }
 0x111   :  { %358 = vst.msk [vmem:[%s768_s4 + $0x68] sm:$0xff] %vm21_vm0, %v342_v12  ;;  %v328_v22 = vadd.f32 %v658_v8, %v305_v14  ;;  %349 = vst.msk [vmem:[%s768_s4 + $0x20] sm:$0xff] %vm21_vm0, %v333_v17  ;;  %v319_v5 = vadd.f32 %v658_v8, %v296_v19 }
 0x112   :  { %357 = vst.msk [vmem:[%s768_s4 + $0x60] sm:$0xff] %vm21_vm0, %v341_v18  ;;  %v327_v23 = vadd.f32 %v658_v8, %v304_v20  ;;  %v336_v24 = vmax.f32 %v320_v21, 0.0 }
 0x113   :  { %v344_v25 = vmax.f32 %v328_v22, 0.0  ;;  %v335_v26 = vmax.f32 %v319_v5, 0.0 }
 0x114   :  { %v343_v27 = vmax.f32 %v327_v23, 0.0  ;;  %352 = vst.msk [vmem:[%s768_s4 + $0x38] sm:$0xff] %vm21_vm0, %v336_v24 }
 0x115   :  { %360 = vst.msk [vmem:[%s768_s4 + $0x78] sm:$0xff] %vm21_vm0, %v344_v25  ;;  %351 = vst.msk [vmem:[%s768_s4 + $0x30] sm:$0xff] %vm21_vm0, %v335_v26 }
 0x116   :  { %359 = vst.msk [vmem:[%s768_s4 + $0x70] sm:$0xff] %vm21_vm0, %v343_v27 }

// kernel: down_forward.5
= control target key start
LH: loop header
LB: loop body
LE: loop exit
PB: predicated region body
PF: predicated region fallthrough
CT: control target
= control target key end

     0   :  { %vm21_vm0 = vcmask 64512   ;;  %s884_s1 = inlined_call_operand.vmem [shape: f32[256,8], index: 1, kind: input, shape index: {}]   ;;  %s885_s0 = inlined_call_operand.vmem [shape: f32[128,256], index: 0, kind: input, shape index: {}]   ;;  %s886_s2 = inlined_call_operand.vmem [shape: f32[1,8], index: 2, kind: input, shape index: {}]   ;;  %s887_s3 = inlined_call_operand.vmem [shape: f32[1,8], index: 3, kind: input, shape index: {}]   ;;  %s888_s4 = inlined_call_operand.vmem [shape: f32[128,8], index: 4, kind: output, shape index: {}]  }
   0x1   :  { %v102_v0 = vld [vmem:[%s884_s1 + $0x80] sm:$0xff]  ;;  %v103_v1 = vld [vmem:[%s884_s1 + $0x88] sm:$0xff]  ;;  %v104_v5 = vld [vmem:[%s884_s1 + $0x90] sm:$0xff] }
   0x2   :  { %v86_v2 = vld [vmem:[%s884_s1] sm:$0xff]  ;;  %v479_v3 = vpack.c.bf16 %v103_v1, %v102_v0  ;;  %v87_v4 = vld [vmem:[%s884_s1 + $0x8] sm:$0xff]  ;;  %v105_v6 = vld [vmem:[%s884_s1 + $0x98] sm:$0xff] }
   0x3   :  { %v481_v7 = vpack.c.bf16 %v87_v4, %v86_v2  ;;  %v483_v8 = vpack.c.bf16 %v105_v6, %v104_v5  ;;  %v88_v9 = vld [vmem:[%s884_s1 + $0x10] sm:$0xff]  ;;  %v89_v10 = vld [vmem:[%s884_s1 + $0x18] sm:$0xff]  ;;  %v106_v11 = vld [vmem:[%s884_s1 + $0xa0] sm:$0xff] }
   0x4   :  { %480 = vmatprep.subr.bf16.mxu0 %v479_v3  ;;  %511 = vmatprep.subr.bf16.mxu1 %v479_v3  ;;  %v107_v12 = vld [vmem:[%s884_s1 + $0xa8] sm:$0xff]  ;;  %v485_v13 = vpack.c.bf16 %v89_v10, %v88_v9  ;;  %v90_v15 = vld [vmem:[%s884_s1 + $0x20] sm:$0xff]  ;;  %v108_v17 = vld [vmem:[%s884_s1 + $0xb0] sm:$0xff] }
   0x5   :  { %482 = vmatpush3.bf16.msra.mxu0 %v481_v7  ;;  %519 = vmatpush3.bf16.msra.mxu1 %v481_v7  ;;  %v487_v14 = vpack.c.bf16 %v107_v12, %v106_v11  ;;  %v91_v16 = vld [vmem:[%s884_s1 + $0x28] sm:$0xff]  ;;  %v109_v18 = vld [vmem:[%s884_s1 + $0xb8] sm:$0xff]  ;;  %v92_v21 = vld [vmem:[%s884_s1 + $0x30] sm:$0xff] }
   0x6   :  { %484 = vmatprep.subr.bf16.mxu0 %v483_v8  ;;  %512 = vmatprep.subr.bf16.mxu1 %v483_v8  ;;  %v489_v19 = vpack.c.bf16 %v91_v16, %v90_v15  ;;  %v491_v20 = vpack.c.bf16 %v109_v18, %v108_v17  ;;  %v93_v22 = vld [vmem:[%s884_s1 + $0x38] sm:$0xff]  ;;  %v110_v23 = vld [vmem:[%s884_s1 + $0xc0] sm:$0xff]  ;;  %v111_v24 = vld [vmem:[%s884_s1 + $0xc8] sm:$0xff]  ;;  %v528_v16 = vmov 0.0  }
   0x7   :  { %v55_v25 = vld [vmem:[%s885_s0 + $0x8] sm:$0xff]  ;;  %v493_v27 = vpack.c.bf16 %v93_v22, %v92_v21  ;;  %v495_v28 = vpack.c.bf16 %v111_v24, %v110_v23  ;;  %v94_v29 = vld [vmem:[%s884_s1 + $0x40] sm:$0xff]  ;;  %v112_v31 = vld [vmem:[%s884_s1 + $0xd0] sm:$0xff]  ;;  %22 = vst.msk [vmem:[#allocation2] sm:$0xff] %vm21_vm0, %v528_v16 }
   0x8   :  { %182 = vmatprep.mubr.f32.mxu0 %v55_v25  ;;  %v71_v26 = vld [vmem:[%s885_s0 + $0x88] sm:$0xff]  ;;  %v113_v32 = vld [vmem:[%s884_s1 + $0xd8] sm:$0xff]  ;;  %v96_v35 = vld [vmem:[%s884_s1 + $0x50] sm:$0xff]  ;;  %23 = vst.msk [vmem:[#allocation2 + $0x8] sm:$0xff] %vm21_vm0, %v528_v16 }
   0x9   :  { %486 = vmatpush3.bf16.msra.mxu0 %v485_v13  ;;  %520 = vmatpush3.bf16.msra.mxu1 %v485_v13  ;;  %v95_v30 = vld [vmem:[%s884_s1 + $0x48] sm:$0xff]  ;;  %v499_v34 = vpack.c.bf16 %v113_v32, %v112_v31  ;;  %v97_v36 = vld [vmem:[%s884_s1 + $0x58] sm:$0xff]  ;;  %v114_v37 = vld [vmem:[%s884_s1 + $0xe0] sm:$0xff]  ;;  %24 = vst.msk [vmem:[#allocation2 + $0x10] sm:$0xff] %vm21_vm0, %v528_v16 }
   0xa   :  { %488 = vmatprep.subr.bf16.mxu0 %v487_v14  ;;  %513 = vmatprep.subr.bf16.mxu1 %v487_v14  ;;  %v497_v33 = vpack.c.bf16 %v95_v30, %v94_v29  ;;  %v115_v38 = vld [vmem:[%s884_s1 + $0xe8] sm:$0xff]  ;;  %v501_v39 = vpack.c.bf16 %v97_v36, %v96_v35  ;;  %v98_v41 = vld [vmem:[%s884_s1 + $0x60] sm:$0xff]  ;;  %v116_v43 = vld [vmem:[%s884_s1 + $0xf0] sm:$0xff]  ;;  %25 = vst.msk [vmem:[#allocation2 + $0x18] sm:$0xff] %vm21_vm0, %v528_v16 }
   0xb   :  { %222 = vmatprep.mubr.f32.mxu1 %v71_v26  ;;  %v503_v40 = vpack.c.bf16 %v115_v38, %v114_v37  ;;  %v99_v42 = vld [vmem:[%s884_s1 + $0x68] sm:$0xff]  ;;  %v117_v44 = vld [vmem:[%s884_s1 + $0xf8] sm:$0xff]  ;;  %v100_v47 = vld [vmem:[%s884_s1 + $0x70] sm:$0xff]  ;;  %26 = vst.msk [vmem:[#allocation2 + $0x20] sm:$0xff] %vm21_vm0, %v528_v16 }
   0xc   :  { %v505_v45 = vpack.c.bf16 %v99_v42, %v98_v41  ;;  %v507_v46 = vpack.c.bf16 %v117_v44, %v116_v43  ;;  %v101_v48 = vld [vmem:[%s884_s1 + $0x78] sm:$0xff]  ;;  %v54_v50 = vld [vmem:[%s885_s0] sm:$0xff]  ;;  %v56_v54 = vld [vmem:[%s885_s0 + $0x10] sm:$0xff]  ;;  %27 = vst.msk [vmem:[#allocation2 + $0x28] sm:$0xff] %vm21_vm0, %v528_v16 }
   0xd   :  { %490 = vmatpush3.bf16.msra.mxu0 %v489_v19  ;;  %521 = vmatpush3.bf16.msra.mxu1 %v489_v19  ;;  %v509_v49 = vpack.c.bf16 %v101_v48, %v100_v47  ;;  %v70_v51 = vld [vmem:[%s885_s0 + $0x80] sm:$0xff]  ;;  %v57_v52 = vld [vmem:[%s885_s0 + $0x18] sm:$0xff]  ;;  %v72_v55 = vld [vmem:[%s885_s0 + $0x90] sm:$0xff]  ;;  %28 = vst.msk [vmem:[#allocation2 + $0x30] sm:$0xff] %vm21_vm0, %v528_v16 }
   0xe   :  { %492 = vmatprep.subr.bf16.mxu0 %v491_v20  ;;  %514 = vmatprep.subr.bf16.mxu1 %v491_v20  ;;  %v73_v53 = vld [vmem:[%s885_s0 + $0x98] sm:$0xff]  ;;  %v59_v56 = vld [vmem:[%s885_s0 + $0x28] sm:$0xff]  ;;  %v58_v58 = vld [vmem:[%s885_s0 + $0x20] sm:$0xff]  ;;  %29 = vst.msk [vmem:[#allocation2 + $0x38] sm:$0xff] %vm21_vm0, %v528_v16 }
   0xf   :  { %v75_v57 = vld [vmem:[%s885_s0 + $0xa8] sm:$0xff]  ;;  %v74_v59 = vld [vmem:[%s885_s0 + $0xa0] sm:$0xff]  ;;  %v61_v60 = vld [vmem:[%s885_s0 + $0x38] sm:$0xff]  ;;  %30 = vst.msk [vmem:[#allocation2 + $0x40] sm:$0xff] %vm21_vm0, %v528_v16 }
  0x10   :  { %v77_v61 = vld [vmem:[%s885_s0 + $0xb8] sm:$0xff]  ;;  %v60_v62 = vld [vmem:[%s885_s0 + $0x30] sm:$0xff]  ;;  %v63_v0 = vld [vmem:[%s885_s0 + $0x48] sm:$0xff]  ;;  %31 = vst.msk [vmem:[#allocation2 + $0x48] sm:$0xff] %vm21_vm0, %v528_v16 }
  0x11   :  { %494 = vmatpush3.bf16.msra.mxu0 %v493_v27  ;;  %522 = vmatpush3.bf16.msra.mxu1 %v493_v27  ;;  %v76_v63 = vld [vmem:[%s885_s0 + $0xb0] sm:$0xff]  ;;  %v79_v1 = vld [vmem:[%s885_s0 + $0xc8] sm:$0xff]  ;;  %v62_v2 = vld [vmem:[%s885_s0 + $0x40] sm:$0xff]  ;;  %32 = vst.msk [vmem:[#allocation2 + $0x50] sm:$0xff] %vm21_vm0, %v528_v16 }
  0x12   :  { %496 = vmatprep.subr.bf16.mxu0 %v495_v28  ;;  %515 = vmatprep.subr.bf16.mxu1 %v495_v28  ;;  %v78_v3 = vld [vmem:[%s885_s0 + $0xc0] sm:$0xff]  ;;  %v65_v4 = vld [vmem:[%s885_s0 + $0x58] sm:$0xff]  ;;  %v64_v6 = vld [vmem:[%s885_s0 + $0x50] sm:$0xff]  ;;  %33 = vst.msk [vmem:[#allocation2 + $0x58] sm:$0xff] %vm21_vm0, %v528_v16 }
  0x13   :  { %v81_v5 = vld [vmem:[%s885_s0 + $0xd8] sm:$0xff]  ;;  %v80_v7 = vld [vmem:[%s885_s0 + $0xd0] sm:$0xff]  ;;  %v67_v8 = vld [vmem:[%s885_s0 + $0x68] sm:$0xff]  ;;  %34 = vst.msk [vmem:[#allocation2 + $0x60] sm:$0xff] %vm21_vm0, %v528_v16 }
  0x14   :  { %v83_v9 = vld [vmem:[%s885_s0 + $0xe8] sm:$0xff]  ;;  %v66_v10 = vld [vmem:[%s885_s0 + $0x60] sm:$0xff]  ;;  %v69_v12 = vld [vmem:[%s885_s0 + $0x78] sm:$0xff]  ;;  %35 = vst.msk [vmem:[#allocation2 + $0x68] sm:$0xff] %vm21_vm0, %v528_v16 }
  0x15   :  { %498 = vmatpush3.bf16.msra.mxu0 %v497_v33  ;;  %523 = vmatpush3.bf16.msra.mxu1 %v497_v33  ;;  %v82_v11 = vld [vmem:[%s885_s0 + $0xe0] sm:$0xff]  ;;  %v85_v13 = vld [vmem:[%s885_s0 + $0xf8] sm:$0xff]  ;;  %v68_v14 = vld [vmem:[%s885_s0 + $0x70] sm:$0xff]  ;;  %36 = vst.msk [vmem:[#allocation2 + $0x70] sm:$0xff] %vm21_vm0, %v528_v16 }
  0x16   :  { %500 = vmatprep.subr.bf16.mxu0 %v499_v34  ;;  %516 = vmatprep.subr.bf16.mxu1 %v499_v34  ;;  %v84_v15 = vld [vmem:[%s885_s0 + $0xf0] sm:$0xff]  ;;  %37 = vst.msk [vmem:[#allocation2 + $0x78] sm:$0xff] %vm21_vm0, %v528_v16  ;;  %v38_v19 = vld [vmem:[#allocation2] sm:$0xff]  ;;  %v39_v29 = vld [vmem:[#allocation2 + $0x8] sm:$0xff] }
  0x17   :  { %v46_v21 = vld [vmem:[#allocation2 + $0x40] sm:$0xff]  ;;  %v47_v31 = vld [vmem:[#allocation2 + $0x48] sm:$0xff] }
  0x18   :  { %v48_v41 = vld [vmem:[#allocation2 + $0x50] sm:$0xff] }
  0x19   :  { %502 = vmatpush3.bf16.msra.mxu0 %v501_v39  ;;  %524 = vmatpush3.bf16.msra.mxu1 %v501_v39  ;;  %v40_v39 = vld [vmem:[#allocation2 + $0x10] sm:$0xff] }
  0x1a   :  { %504 = vmatprep.subr.bf16.mxu0 %v503_v40  ;;  %517 = vmatprep.subr.bf16.mxu1 %v503_v40 }
  0x1d   :  { %506 = vmatpush3.bf16.msra.mxu0 %v505_v45  ;;  %525 = vmatpush3.bf16.msra.mxu1 %v505_v45  ;;  %v769_v45 = vld [vmem:[%s886_s2] ss:$0 sm:$0xff] }
  0x1e   :  { %508 = vmatprep.subr.bf16.mxu0 %v507_v46  ;;  %518 = vmatprep.subr.bf16.mxu1 %v507_v46  ;;  %v774_v46 = vld [vmem:[%s887_s3] ss:$0 sm:$0xff] }
  0x21   :  { %510 = vmatpush3.bf16.msra.mxu0 %v509_v49  ;;  %526 = vmatpush3.bf16.msra.mxu1 %v509_v49 }
  0x24   :  { %183 = vmatmul.mubr.f32.vlgmr.msra.gmra.mrb[0].mxu0 %v54_v50  ;;  %223 = vmatmul.mubr.f32.vlgmr.msra.gmra.mrb[0].mxu1 %v70_v51  ;;  %v41_v51 = vld [vmem:[#allocation2 + $0x18] sm:$0xff] }
  0x25   :  { %187 = vmatprep.mubr.f32.mxu0 %v57_v52  ;;  %227 = vmatprep.mubr.f32.mxu1 %v73_v53 }
  0x28   :  { %188 = vmatmul.mubr.f32.gmra.mrb[2].mxu0 %v56_v54  ;;  %228 = vmatmul.mubr.f32.gmra.mrb[2].mxu1 %v72_v55  ;;  %v49_v55 = vld [vmem:[#allocation2 + $0x58] sm:$0xff] }
  0x29   :  { %192 = vmatprep.mubr.f32.mxu0 %v59_v56  ;;  %232 = vmatprep.mubr.f32.mxu1 %v75_v57 }
  0x2c   :  { %193 = vmatmul.mubr.f32.gmra.mrb[4].mxu0 %v58_v58  ;;  %233 = vmatmul.mubr.f32.gmra.mrb[4].mxu1 %v74_v59 }
  0x2d   :  { %197 = vmatprep.mubr.f32.mxu0 %v61_v60  ;;  %237 = vmatprep.mubr.f32.mxu1 %v77_v61 }
  0x30   :  { %198 = vmatmul.mubr.f32.gmra.mrb[6].mxu0 %v60_v62  ;;  %238 = vmatmul.mubr.f32.gmra.mrb[6].mxu1 %v76_v63 }
  0x31   :  { %202 = vmatprep.mubr.f32.mxu0 %v63_v0  ;;  %242 = vmatprep.mubr.f32.mxu1 %v79_v1 }
  0x34   :  { %203 = vmatmul.mubr.f32.gmra.mrb[8].mxu0 %v62_v2  ;;  %243 = vmatmul.mubr.f32.gmra.mrb[8].mxu1 %v78_v3 }
  0x35   :  { %207 = vmatprep.mubr.f32.mxu0 %v65_v4  ;;  %247 = vmatprep.mubr.f32.mxu1 %v81_v5 }
  0x38   :  { %208 = vmatmul.mubr.f32.gmra.mrb[10].mxu0 %v64_v6  ;;  %248 = vmatmul.mubr.f32.gmra.mrb[10].mxu1 %v80_v7 }
  0x39   :  { %212 = vmatprep.mubr.f32.mxu0 %v67_v8  ;;  %252 = vmatprep.mubr.f32.mxu1 %v83_v9 }
  0x3c   :  { %213 = vmatmul.mubr.f32.gmra.mrb[12].mxu0 %v66_v10  ;;  %253 = vmatmul.mubr.f32.gmra.mrb[12].mxu1 %v82_v11  ;;  %v42_v11 = vld [vmem:[#allocation2 + $0x20] sm:$0xff] }
  0x3d   :  { %217 = vmatprep.mubr.f32.mxu0 %v69_v12  ;;  %257 = vmatprep.mubr.f32.mxu1 %v85_v13  ;;  %v50_v12 = vld [vmem:[#allocation2 + $0x60] sm:$0xff] }
  0x40   :  { %218 = vmatmul.mubr.f32.gmra.mrb[14].mxu0 %v68_v14  ;;  %258 = vmatmul.mubr.f32.gmra.mrb[14].mxu1 %v84_v15 }
  0xf7   :  { %v431_v17 = vpop.f32.mrb[0].mxu0  ;;  %v455_v18 = vpop.f32.mrb[0].mxu1 }
  0xf8   :  { %v432_v20 = vpop.f32.mrb[1].mxu0  ;;  %v456_v22 = vpop.f32.mrb[1].mxu1 }
  0xf9   :  { %v433_v23 = vadd.f32 %v432_v20, %v431_v17  ;;  %v457_v24 = vadd.f32 %v456_v22, %v455_v18 }
  0xfb   :  { %v263_v25 = vadd.f32 %v433_v23, %v38_v19  ;;  %v271_v26 = vadd.f32 %v457_v24, %v46_v21  ;;  %v434_v27 = vpop.f32.mrb[2].mxu0  ;;  %v458_v28 = vpop.f32.mrb[2].mxu1 }
  0xfc   :  { %v435_v30 = vpop.f32.mrb[3].mxu0  ;;  %v459_v32 = vpop.f32.mrb[3].mxu1 }
  0xfd   :  { %280 = vst.msk [vmem:[#allocation2] sm:$0xff] %vm21_vm0, %v263_v25  ;;  %288 = vst.msk [vmem:[#allocation2 + $0x40] sm:$0xff] %vm21_vm0, %v271_v26  ;;  %v436_v33 = vadd.f32 %v435_v30, %v434_v27  ;;  %v460_v34 = vadd.f32 %v459_v32, %v458_v28  ;;  %v51_v30 = vld [vmem:[#allocation2 + $0x68] sm:$0xff] }
  0xff   :  { %v264_v35 = vadd.f32 %v436_v33, %v39_v29  ;;  %v272_v36 = vadd.f32 %v460_v34, %v47_v31  ;;  %v437_v37 = vpop.f32.mrb[4].mxu0  ;;  %v461_v38 = vpop.f32.mrb[4].mxu1  ;;  %v43_v29 = vld [vmem:[#allocation2 + $0x28] sm:$0xff] }
 0x100   :  { %v438_v40 = vpop.f32.mrb[5].mxu0  ;;  %v462_v42 = vpop.f32.mrb[5].mxu1 }
 0x101   :  { %281 = vst.msk [vmem:[#allocation2 + $0x8] sm:$0xff] %vm21_vm0, %v264_v35  ;;  %289 = vst.msk [vmem:[#allocation2 + $0x48] sm:$0xff] %vm21_vm0, %v272_v36  ;;  %v439_v43 = vadd.f32 %v438_v40, %v437_v37  ;;  %v463_v44 = vadd.f32 %v462_v42, %v461_v38 }
 0x103   :  { %v265_v47 = vadd.f32 %v439_v43, %v40_v39  ;;  %v273_v48 = vadd.f32 %v463_v44, %v48_v41  ;;  %v440_v49 = vpop.f32.mrb[6].mxu0  ;;  %v464_v50 = vpop.f32.mrb[6].mxu1 }
 0x104   :  { %v299_v52 = vld [vmem:[#allocation2] sm:$0xff]  ;;  %v441_v54 = vpop.f32.mrb[7].mxu0  ;;  %v465_v56 = vpop.f32.mrb[7].mxu1 }
 0x105   :  { %v307_v53 = vld [vmem:[#allocation2 + $0x40] sm:$0xff]  ;;  %v322_v57 = vmul.f32 %v769_v45, %v299_v52  ;;  %282 = vst.msk [vmem:[#allocation2 + $0x10] sm:$0xff] %vm21_vm0, %v265_v47  ;;  %290 = vst.msk [vmem:[#allocation2 + $0x50] sm:$0xff] %vm21_vm0, %v273_v48  ;;  %v442_v59 = vadd.f32 %v441_v54, %v440_v49  ;;  %v466_v60 = vadd.f32 %v465_v56, %v464_v50  ;;  %v44_v49 = vld [vmem:[#allocation2 + $0x30] sm:$0xff] }
 0x106   :  { %v330_v58 = vmul.f32 %v769_v45, %v307_v53  ;;  %v52_v50 = vld [vmem:[#allocation2 + $0x70] sm:$0xff] }
 0x107   :  { %v345_v61 = vadd.f32 %v774_v46, %v322_v57  ;;  %v266_v63 = vadd.f32 %v442_v59, %v41_v51  ;;  %v274_v0 = vadd.f32 %v466_v60, %v49_v55  ;;  %v443_v1 = vpop.f32.mrb[8].mxu0  ;;  %v467_v2 = vpop.f32.mrb[8].mxu1  ;;  %v45_v59 = vld [vmem:[#allocation2 + $0x38] sm:$0xff] }
 0x108   :  { %v353_v62 = vadd.f32 %v774_v46, %v330_v58  ;;  %v300_v3 = vld [vmem:[#allocation2 + $0x8] sm:$0xff]  ;;  %v444_v5 = vpop.f32.mrb[9].mxu0  ;;  %v468_v6 = vpop.f32.mrb[9].mxu1 }
 0x109   :  { %v308_v4 = vld [vmem:[#allocation2 + $0x48] sm:$0xff]  ;;  %v361_v7 = vmax.f32 %v345_v61, 0.0  ;;  %v323_v9 = vmul.f32 %v769_v45, %v300_v3  ;;  %283 = vst.msk [vmem:[#allocation2 + $0x18] sm:$0xff] %vm21_vm0, %v266_v63  ;;  %291 = vst.msk [vmem:[#allocation2 + $0x58] sm:$0xff] %vm21_vm0, %v274_v0  ;;  %v445_v13 = vadd.f32 %v444_v5, %v443_v1  ;;  %v469_v14 = vadd.f32 %v468_v6, %v467_v2  ;;  %v53_v61 = vld [vmem:[#allocation2 + $0x78] sm:$0xff] }
 0x10a   :  { %v369_v8 = vmax.f32 %v353_v62, 0.0  ;;  %v331_v10 = vmul.f32 %v769_v45, %v308_v4 }
 0x10b   :  { %377 = vst.msk [vmem:[%s888_s4] sm:$0xff] %vm21_vm0, %v361_v7  ;;  %v346_v15 = vadd.f32 %v774_v46, %v323_v9  ;;  %v446_v17 = vpop.f32.mrb[10].mxu0  ;;  %v470_v18 = vpop.f32.mrb[10].mxu1  ;;  %v267_v21 = vadd.f32 %v445_v13, %v42_v11  ;;  %v275_v22 = vadd.f32 %v469_v14, %v50_v12 }
 0x10c   :  { %385 = vst.msk [vmem:[%s888_s4 + $0x40] sm:$0xff] %vm21_vm0, %v369_v8  ;;  %v354_v16 = vadd.f32 %v774_v46, %v331_v10  ;;  %v301_v19 = vld [vmem:[#allocation2 + $0x10] sm:$0xff]  ;;  %v447_v23 = vpop.f32.mrb[11].mxu0  ;;  %v471_v24 = vpop.f32.mrb[11].mxu1 }
 0x10d   :  { %v309_v20 = vld [vmem:[#allocation2 + $0x50] sm:$0xff]  ;;  %v362_v25 = vmax.f32 %v346_v15, 0.0  ;;  %v324_v27 = vmul.f32 %v769_v45, %v301_v19  ;;  %284 = vst.msk [vmem:[#allocation2 + $0x20] sm:$0xff] %vm21_vm0, %v267_v21  ;;  %292 = vst.msk [vmem:[#allocation2 + $0x60] sm:$0xff] %vm21_vm0, %v275_v22  ;;  %v448_v31 = vadd.f32 %v447_v23, %v446_v17  ;;  %v472_v32 = vadd.f32 %v471_v24, %v470_v18 }
 0x10e   :  { %v370_v26 = vmax.f32 %v354_v16, 0.0  ;;  %v332_v28 = vmul.f32 %v769_v45, %v309_v20 }
 0x10f   :  { %378 = vst.msk [vmem:[%s888_s4 + $0x8] sm:$0xff] %vm21_vm0, %v362_v25  ;;  %v347_v33 = vadd.f32 %v774_v46, %v324_v27  ;;  %v449_v35 = vpop.f32.mrb[12].mxu0  ;;  %v473_v36 = vpop.f32.mrb[12].mxu1  ;;  %v268_v39 = vadd.f32 %v448_v31, %v43_v29  ;;  %v276_v40 = vadd.f32 %v472_v32, %v51_v30 }
 0x110   :  { %386 = vst.msk [vmem:[%s888_s4 + $0x48] sm:$0xff] %vm21_vm0, %v370_v26  ;;  %v355_v34 = vadd.f32 %v774_v46, %v332_v28  ;;  %v302_v37 = vld [vmem:[#allocation2 + $0x18] sm:$0xff]  ;;  %v450_v41 = vpop.f32.mrb[13].mxu0  ;;  %v474_v42 = vpop.f32.mrb[13].mxu1 }
 0x111   :  { %v310_v38 = vld [vmem:[#allocation2 + $0x58] sm:$0xff]  ;;  %v363_v43 = vmax.f32 %v347_v33, 0.0  ;;  %v325_v47 = vmul.f32 %v769_v45, %v302_v37  ;;  %285 = vst.msk [vmem:[#allocation2 + $0x28] sm:$0xff] %vm21_vm0, %v268_v39  ;;  %293 = vst.msk [vmem:[#allocation2 + $0x68] sm:$0xff] %vm21_vm0, %v276_v40  ;;  %v451_v51 = vadd.f32 %v450_v41, %v449_v35  ;;  %v475_v52 = vadd.f32 %v474_v42, %v473_v36 }
 0x112   :  { %v371_v44 = vmax.f32 %v355_v34, 0.0  ;;  %v333_v48 = vmul.f32 %v769_v45, %v310_v38 }
 0x113   :  { %379 = vst.msk [vmem:[%s888_s4 + $0x10] sm:$0xff] %vm21_vm0, %v363_v43  ;;  %v348_v53 = vadd.f32 %v774_v46, %v325_v47  ;;  %v452_v55 = vpop.f32.mrb[14].mxu0  ;;  %v476_v56 = vpop.f32.mrb[14].mxu1  ;;  %v269_v57 = vadd.f32 %v451_v51, %v44_v49  ;;  %v277_v58 = vadd.f32 %v475_v52, %v52_v50 }
 0x114   :  { %387 = vst.msk [vmem:[%s888_s4 + $0x50] sm:$0xff] %vm21_vm0, %v371_v44  ;;  %v356_v54 = vadd.f32 %v774_v46, %v333_v48  ;;  %v453_v60 = vpop.f32.mrb[15].mxu0  ;;  %v477_v62 = vpop.f32.mrb[15].mxu1  ;;  %v303_v1 = vld [vmem:[#allocation2 + $0x20] sm:$0xff] }
 0x115   :  { %v364_v63 = vmax.f32 %v348_v53, 0.0  ;;  %v311_v2 = vld [vmem:[#allocation2 + $0x60] sm:$0xff]  ;;  %v454_v3 = vadd.f32 %v453_v60, %v452_v55  ;;  %v478_v4 = vadd.f32 %v477_v62, %v476_v56  ;;  %v326_v5 = vmul.f32 %v769_v45, %v303_v1  ;;  %286 = vst.msk [vmem:[#allocation2 + $0x30] sm:$0xff] %vm21_vm0, %v269_v57  ;;  %294 = vst.msk [vmem:[#allocation2 + $0x70] sm:$0xff] %vm21_vm0, %v277_v58 }
 0x116   :  { %v372_v0 = vmax.f32 %v356_v54, 0.0  ;;  %v334_v6 = vmul.f32 %v769_v45, %v311_v2 }
 0x117   :  { %380 = vst.msk [vmem:[%s888_s4 + $0x18] sm:$0xff] %vm21_vm0, %v364_v63  ;;  %v270_v7 = vadd.f32 %v454_v3, %v45_v59  ;;  %v278_v8 = vadd.f32 %v478_v4, %v53_v61  ;;  %v349_v9 = vadd.f32 %v774_v46, %v326_v5 }
 0x118   :  { %388 = vst.msk [vmem:[%s888_s4 + $0x58] sm:$0xff] %vm21_vm0, %v372_v0  ;;  %v357_v10 = vadd.f32 %v774_v46, %v334_v6  ;;  %v304_v11 = vld [vmem:[#allocation2 + $0x28] sm:$0xff] }
 0x119   :  { %v312_v12 = vld [vmem:[#allocation2 + $0x68] sm:$0xff]  ;;  %287 = vst.msk [vmem:[#allocation2 + $0x38] sm:$0xff] %vm21_vm0, %v270_v7  ;;  %295 = vst.msk [vmem:[#allocation2 + $0x78] sm:$0xff] %vm21_vm0, %v278_v8  ;;  %v365_v13 = vmax.f32 %v349_v9, 0.0  ;;  %v327_v15 = vmul.f32 %v769_v45, %v304_v11 }
 0x11a   :  { %v373_v14 = vmax.f32 %v357_v10, 0.0  ;;  %v335_v16 = vmul.f32 %v769_v45, %v312_v12 }
 0x11b   :  { %381 = vst.msk [vmem:[%s888_s4 + $0x20] sm:$0xff] %vm21_vm0, %v365_v13  ;;  %v350_v17 = vadd.f32 %v774_v46, %v327_v15 }
 0x11c   :  { %389 = vst.msk [vmem:[%s888_s4 + $0x60] sm:$0xff] %vm21_vm0, %v373_v14  ;;  %v358_v18 = vadd.f32 %v774_v46, %v335_v16  ;;  %v305_v19 = vld [vmem:[#allocation2 + $0x30] sm:$0xff] }
 0x11d   :  { %v313_v20 = vld [vmem:[#allocation2 + $0x70] sm:$0xff]  ;;  %v366_v21 = vmax.f32 %v350_v17, 0.0  ;;  %v328_v23 = vmul.f32 %v769_v45, %v305_v19 }
 0x11e   :  { %v374_v22 = vmax.f32 %v358_v18, 0.0  ;;  %v336_v24 = vmul.f32 %v769_v45, %v313_v20 }
 0x11f   :  { %382 = vst.msk [vmem:[%s888_s4 + $0x28] sm:$0xff] %vm21_vm0, %v366_v21  ;;  %v351_v25 = vadd.f32 %v774_v46, %v328_v23 }
 0x120   :  { %390 = vst.msk [vmem:[%s888_s4 + $0x68] sm:$0xff] %vm21_vm0, %v374_v22  ;;  %v359_v26 = vadd.f32 %v774_v46, %v336_v24  ;;  %v306_v27 = vld [vmem:[#allocation2 + $0x38] sm:$0xff] }
 0x121   :  { %v314_v28 = vld [vmem:[#allocation2 + $0x78] sm:$0xff]  ;;  %v329_v29 = vmul.f32 %v769_v45, %v306_v27  ;;  %v367_v31 = vmax.f32 %v351_v25, 0.0 }
 0x122   :  { %v337_v30 = vmul.f32 %v769_v45, %v314_v28  ;;  %v375_v32 = vmax.f32 %v359_v26, 0.0 }
 0x123   :  { %v352_v33 = vadd.f32 %v774_v46, %v329_v29  ;;  %383 = vst.msk [vmem:[%s888_s4 + $0x30] sm:$0xff] %vm21_vm0, %v367_v31 }
 0x124   :  { %v360_v34 = vadd.f32 %v774_v46, %v337_v30  ;;  %391 = vst.msk [vmem:[%s888_s4 + $0x70] sm:$0xff] %vm21_vm0, %v375_v32 }
 0x125   :  { %v368_v35 = vmax.f32 %v352_v33, 0.0 }
 0x126   :  { %v376_v36 = vmax.f32 %v360_v34, 0.0 }
 0x127   :  { %384 = vst.msk [vmem:[%s888_s4 + $0x38] sm:$0xff] %vm21_vm0, %v368_v35 }
 0x128   :  { %392 = vst.msk [vmem:[%s888_s4 + $0x78] sm:$0xff] %vm21_vm0, %v376_v36 }

</bundles_post_ra>
